<compile_context>
chip_gen: v7x
topology: tpu7x:2x2x1
jax: 0.10.0
libtpu: 0.0.40
codegen_flags: <defaults>
</compile_context>

<pallas_src>
import jax
import jax.numpy as jnp
from jax import lax
from jax.experimental import pallas as pl
from jax.experimental.pallas import tpu as pltpu

# ----------------------------- model hyperparams -----------------------------
IMAGE_SIZE = 16
PATCH_SIZE = 8
CHANNELS = 4
NUM_CLASSES = 10
DIM = 32
DEPTH = 2
HEADS = 4
DIM_HEAD = 8
MLP_DIM = 64
BRANCHES = 2                                      # num_parallel_branches
POOL = "cls"
INNER = HEADS * DIM_HEAD                          # 32
PATCH_DIM = CHANNELS * PATCH_SIZE * PATCH_SIZE    # 256
NUM_PATCHES = (IMAGE_SIZE // PATCH_SIZE) ** 2     # 4
N_TOK = NUM_PATCHES + 1                           # 5 (cls + patches)
LN_EPS = 1e-5
BH = BRANCHES * HEADS                             # 8 fused (branch, head) pairs
FUSED_INNER = BH * DIM_HEAD                       # 64
INV_SQRT2 = 0.7071067811865475244
NEG_INF = -1e30


# ------------------------------- fused Pallas kernel -------------------------------
def vit_fused_kernel(xpad_ref, pw_ref, add_ref,
                     wq_ref, bq_ref, wk_ref, bk_ref, wv_ref, bv_ref,
                     wout_ref, bout_ref, w1_ref, b1_ref, w2_ref, b2_ref,
                     hw_ref, hb_ref,
                     bias_ref, tile_ref, bdmask_ref, blkones_ref, sel_ref,
                     o_ref):
    def normalize(z):                 # LayerNorm w/o affine (affine folded into weights)
        mu = jnp.mean(z, axis=-1, keepdims=True)
        var = jnp.mean((z - mu) ** 2, axis=-1, keepdims=True)
        return (z - mu) * lax.rsqrt(var + LN_EPS)

    # patch embedding for all token rows at once (cls rows have zero inputs; the
    # addend carries cls_token+pos for cls rows, patch_bias+pos for patch rows).
    x = jnp.dot(xpad_ref[...], pw_ref[...],
                preferred_element_type=jnp.float32) + add_ref[...]        # (nt, DIM)

    # constant structural matrices (loaded once, reused by both layers)
    attn_bias = bias_ref[...]      # (nt, BH*nt)   additive batch mask (0 / -1e30)
    tile_mat = tile_ref[...]       # (BH*nt, nt)   row-tiling selector
    bd_mask = bdmask_ref[...]      # (BH*nt, FUSED_INNER) block-diag head mask
    blk_ones = blkones_ref[...]    # (BH*nt, BH*nt) per-head-block all-ones

    for d in range(DEPTH):
        # ---------- parallel attention branches: all 8 fused heads at once ----------
        xhat = normalize(x)
        q = jnp.dot(xhat, wq_ref[d], preferred_element_type=jnp.float32) + bq_ref[d]  # scale folded
        k = jnp.dot(xhat, wk_ref[d], preferred_element_type=jnp.float32) + bk_ref[d]
        v = jnp.dot(xhat, wv_ref[d], preferred_element_type=jnp.float32) + bv_ref[d]

        # block-diagonal K / V: row block g holds only head g's columns (built on MXU)
        k_bd = jnp.dot(tile_mat, k, preferred_element_type=jnp.float32) * bd_mask   # (BH*nt, 64)
        v_bd = jnp.dot(tile_mat, v, preferred_element_type=jnp.float32) * bd_mask   # (BH*nt, 64)

        # scores for all heads: (nt, BH*nt); column block g = Q_g @ K_g^T
        s = jnp.einsum("nd,md->nm", q, k_bd,
                       preferred_element_type=jnp.float32) + attn_bias
        s = s - jnp.max(s, axis=-1, keepdims=True)      # per-row shift (softmax-invariant)
        e = jnp.exp(s)                                  # masked entries underflow to 0
        den = jnp.dot(e, blk_ones, preferred_element_type=jnp.float32)  # per-(head,batch) sums
        p = e / den
        attn_out = jnp.dot(p, v_bd, preferred_element_type=jnp.float32)  # (nt, 64) head-concat
        x = x + jnp.dot(attn_out, wout_ref[d],
                        preferred_element_type=jnp.float32) + bout_ref[d]

        # ---------- parallel feed-forward branches (hidden dims concatenated: N=128) ----------
        xhat = normalize(x)
        hdn = jnp.dot(xhat, w1_ref[d], preferred_element_type=jnp.float32) + b1_ref[d]
        hdn = 0.5 * hdn * (1.0 + lax.erf(hdn * INV_SQRT2))               # exact GELU
        x = x + jnp.dot(hdn, w2_ref[d], preferred_element_type=jnp.float32) + b2_ref[d]

    # cls pooling via constant selection matmul (no sublane shuffles), LN folded into head
    pooled = jnp.dot(sel_ref[...], x, preferred_element_type=jnp.float32)   # (B, DIM)
    ph = normalize(pooled)
    o_ref[...] = jnp.dot(ph, hw_ref[...],
                         preferred_element_type=jnp.float32) + hb_ref[...]


# ---------------- one-time weight repack + constants (runs OUTSIDE jit) ----------------
def prepare(params, batch):
    scale = DIM_HEAD ** -0.5
    wq, bq, wk, bk, wv, bv = [], [], [], [], [], []
    wout, bout, w1, b1, w2, b2 = [], [], [], [], [], []
    for attn_branches, ff_branches in params["layers"]:
        qw, kw, vw, qb, kb, vb, wouts = [], [], [], [], [], [], []
        bouts = 0.0
        for bp in attn_branches:
            gw = bp["g"].reshape(DIM, 1) * bp["wqkv"]     # fold LN scale into weight
            fb = bp["b"] @ bp["wqkv"]                     # fold LN bias into bias
            qw.append(gw[:, 0:INNER] * scale)             # fold attention scale into Q
            kw.append(gw[:, INNER:2 * INNER])
            vw.append(gw[:, 2 * INNER:])
            qb.append(fb[:, 0:INNER] * scale)
            kb.append(fb[:, INNER:2 * INNER])
            vb.append(fb[:, 2 * INNER:])
            wouts.append(bp["wout"])
            bouts = bouts + bp["bout"]
        wq.append(jnp.concatenate(qw, axis=1)); bq.append(jnp.concatenate(qb, axis=1))
        wk.append(jnp.concatenate(kw, axis=1)); bk.append(jnp.concatenate(kb, axis=1))
        wv.append(jnp.concatenate(vw, axis=1)); bv.append(jnp.concatenate(vb, axis=1))
        wout.append(jnp.concatenate(wouts, axis=0))        # (BRANCHES*INNER, DIM): sums branches
        bout.append(bouts)

        w1s, b1s, w2s = [], [], []
        b2s = 0.0
        for bp in ff_branches:
            w1s.append(bp["g"].reshape(DIM, 1) * bp["w1"])
            b1s.append(bp["b1"] + bp["b"] @ bp["w1"])
            w2s.append(bp["w2"])
            b2s = b2s + bp["b2"]
        w1.append(jnp.concatenate(w1s, axis=1)); b1.append(jnp.concatenate(b1s, axis=1))
        w2.append(jnp.concatenate(w2s, axis=0)); b2.append(b2s)

    head_w = params["head_g"].reshape(DIM, 1) * params["head_w"]
    head_b = params["head_bias"] + params["head_b"] @ params["head_w"]

    nt = batch * N_TOK
    # per-row additive term: (cls_token + pos[0]) for cls rows, (patch_bias + pos[i]) otherwise
    add_one = jnp.concatenate(
        [params["cls_token"][0] + params["pos_emb"][0, 0:1],
         params["patch_b"] + params["pos_emb"][0, 1:N_TOK]], axis=0)       # (N_TOK, DIM)
    addend = jnp.tile(add_one, (batch, 1))                                 # (nt, DIM)

    # constant structural matrices for the fused-head attention
    row = jnp.arange(nt)[:, None]
    col = jnp.arange(BH * nt)[None, :]
    attn_bias = jnp.where((row // N_TOK) == ((col % nt) // N_TOK),
                          0.0, NEG_INF).astype(jnp.float32)                # (nt, BH*nt)
    i = jnp.arange(BH * nt)[:, None]
    tile_mat = (jnp.arange(nt)[None, :] == (i % nt)).astype(jnp.float32)   # (BH*nt, nt)
    bd_mask = ((i // nt) == (jnp.arange(FUSED_INNER)[None, :] // DIM_HEAD)
               ).astype(jnp.float32)                                        # (BH*nt, FUSED_INNER)
    blk_ones = ((i // nt) == (jnp.arange(BH * nt)[None, :] // nt)
                ).astype(jnp.float32)                                       # (BH*nt, BH*nt)
    sel = (jnp.arange(nt)[None, :] ==
           (jnp.arange(batch)[:, None] * N_TOK)).astype(jnp.float32)        # (B, nt)

    return {
        "patch_w": params["patch_w"], "addend": addend,
        "wq": jnp.stack(wq), "bq": jnp.stack(bq),
        "wk": jnp.stack(wk), "bk": jnp.stack(bk),
        "wv": jnp.stack(wv), "bv": jnp.stack(bv),
        "wout": jnp.stack(wout), "bout": jnp.stack(bout),
        "w1": jnp.stack(w1), "b1": jnp.stack(b1),
        "w2": jnp.stack(w2), "b2": jnp.stack(b2),
        "head_w": head_w, "head_b": head_b,
        "attn_bias": attn_bias, "tile_mat": tile_mat, "bd_mask": bd_mask,
        "blk_ones": blk_ones, "sel": sel,
    }


# ------------------------------- full ViT forward ------------------------------
def vit_forward(img, packed):
    B = img.shape[0]
    hg, wg = IMAGE_SIZE // PATCH_SIZE, IMAGE_SIZE // PATCH_SIZE
    # 'b c (h p1) (w p2) -> b (h w) (p1 p2 c)'
    patches = img.reshape(B, CHANNELS, hg, PATCH_SIZE, wg, PATCH_SIZE)
    patches = patches.transpose(0, 2, 4, 3, 5, 1).reshape(B, hg * wg, PATCH_DIM)
    # insert a zero input row per batch element in the cls-token slot
    xpad = jnp.concatenate(
        [jnp.zeros((B, 1, PATCH_DIM), jnp.float32), patches], axis=1
    ).reshape(B * N_TOK, PATCH_DIM)

    args = (xpad, packed["patch_w"], packed["addend"],
            packed["wq"], packed["bq"], packed["wk"], packed["bk"],
            packed["wv"], packed["bv"],
            packed["wout"], packed["bout"],
            packed["w1"], packed["b1"], packed["w2"], packed["b2"],
            packed["head_w"], packed["head_b"],
            packed["attn_bias"], packed["tile_mat"], packed["bd_mask"],
            packed["blk_ones"], packed["sel"])

    vmem_spec = pl.BlockSpec(memory_space=pltpu.MemorySpace.VMEM)
    return pl.pallas_call(
        vit_fused_kernel,
        out_shape=jax.ShapeDtypeStruct((B, NUM_CLASSES), jnp.float32),
        in_specs=[vmem_spec] * len(args),
        out_specs=vmem_spec,
    )(*args)


# ------------------------------- pure-JAX reference ----------------------------
def _layernorm(x, g, b):
    mu = jnp.mean(x, axis=-1, keepdims=True)
    var = jnp.mean((x - mu) ** 2, axis=-1, keepdims=True)
    return (x - mu) * lax.rsqrt(var + LN_EPS) * g + b


def _ref_attn(x, p):
    xn = _layernorm(x, p["g"], p["b"])
    qkv = xn @ p["wqkv"]
    q, k, v = jnp.split(qkv, 3, axis=-1)
    B, n, _ = x.shape
    sh = lambda t: t.reshape(B, n, HEADS, DIM_HEAD).transpose(0, 2, 1, 3)
    q, k, v = sh(q), sh(k), sh(v)
    dots = jnp.einsum("bhnd,bhmd->bhnm", q, k) * (DIM_HEAD ** -0.5)
    attn = jax.nn.softmax(dots, axis=-1)
    o = jnp.einsum("bhnm,bhmd->bhnd", attn, v)
    o = o.transpose(0, 2, 1, 3).reshape(B, n, INNER)
    return o @ p["wout"] + p["bout"]


def _ref_ff(x, p):
    xn = _layernorm(x, p["g"], p["b"])
    h = xn @ p["w1"] + p["b1"]
    h = 0.5 * h * (1.0 + lax.erf(h * INV_SQRT2))
    return h @ p["w2"] + p["b2"]


def ref_forward(img, params):
    B, C, H, W = img.shape
    hg, wg = H // PATCH_SIZE, W // PATCH_SIZE
    x = img.reshape(B, C, hg, PATCH_SIZE, wg, PATCH_SIZE)
    x = x.transpose(0, 2, 4, 3, 5, 1).reshape(B, hg * wg, PATCH_DIM)
    x = x @ params["patch_w"] + params["patch_b"]
    cls = jnp.broadcast_to(params["cls_token"], (B, 1, DIM))
    x = jnp.concatenate([cls, x], axis=1)
    x = x + params["pos_emb"][:, : x.shape[1]]
    for attn_branches, ff_branches in params["layers"]:
        x = sum(_ref_attn(x, bp) for bp in attn_branches) + x
        x = sum(_ref_ff(x, bp) for bp in ff_branches) + x
    pooled = x[:, 0] if POOL == "cls" else x.mean(axis=1)
    xn = _layernorm(pooled, params["head_g"], params["head_b"])
    return xn @ params["head_w"] + params["head_bias"]


# ------------------------------- parameter init ---------------------------------
def init_params(key):
    keys = iter(jax.random.split(key, 256))
    nxt = lambda: next(keys)
    nrm = lambda shape, s=0.02: jax.random.normal(nxt(), shape, jnp.float32) * s

    params = {
        "patch_w": nrm((PATCH_DIM, DIM)),
        "patch_b": nrm((1, DIM)),
        "pos_emb": nrm((1, NUM_PATCHES + 1, DIM)),
        "cls_token": nrm((1, 1, DIM)),
        "head_g": jnp.ones((1, DIM), jnp.float32),
        "head_b": jnp.zeros((1, DIM), jnp.float32),
        "head_w": nrm((DIM, NUM_CLASSES)),
        "head_bias": nrm((1, NUM_CLASSES)),
        "layers": [],
    }
    for _ in range(DEPTH):
        attn_branches = []
        for _ in range(BRANCHES):
            attn_branches.append({
                "g": jnp.ones((1, DIM), jnp.float32),
                "b": jnp.zeros((1, DIM), jnp.float32),
                "wqkv": nrm((DIM, 3 * INNER)),
                "wout": nrm((INNER, DIM)),
                "bout": nrm((1, DIM)),
            })
        ff_branches = []
        for _ in range(BRANCHES):
            ff_branches.append({
                "g": jnp.ones((1, DIM), jnp.float32),
                "b": jnp.zeros((1, DIM), jnp.float32),
                "w1": nrm((DIM, MLP_DIM)),
                "b1": nrm((1, MLP_DIM)),
                "w2": nrm((MLP_DIM, DIM)),
                "b2": nrm((1, DIM)),
            })
        params["layers"].append((attn_branches, ff_branches))
    return params


# ------------------------------------ main ---------------------------------------
if __name__ == "__main__":
    key = jax.random.PRNGKey(0)
    pkey, ikey = jax.random.split(key)
    params = init_params(pkey)

    # NCHW image, small shapes
    B = 2
    img = jax.random.normal(ikey, (B, CHANNELS, IMAGE_SIZE, IMAGE_SIZE), jnp.float32)

    # One-time repack OUTSIDE the jitted forward (perf feedback #1)
    packed = jax.tree_util.tree_map(jax.block_until_ready, prepare(params, B))

    fwd = jax.jit(vit_forward)
    logits = jax.block_until_ready(fwd(img, packed))

    ref = jax.block_until_ready(ref_forward(img, params))
    assert logits.shape == (B, NUM_CLASSES)
    assert jnp.allclose(logits, ref, rtol=1e-4, atol=1e-4), (
        f"mismatch: max abs diff {jnp.max(jnp.abs(logits - ref))}")

    print("KERNEL_OK")
</pallas_src>

<mosaic_0001>
module attributes {stable_mosaic.version = 11 : i64} {
  func.func @vit_fused_kernel(%arg0: memref<10x256xf32, #tpu.memory_space<vmem>>, %arg1: memref<256x32xf32, #tpu.memory_space<vmem>>, %arg2: memref<10x32xf32, #tpu.memory_space<vmem>>, %arg3: memref<2x32x64xf32, #tpu.memory_space<vmem>>, %arg4: memref<2x1x64xf32, #tpu.memory_space<vmem>>, %arg5: memref<2x32x64xf32, #tpu.memory_space<vmem>>, %arg6: memref<2x1x64xf32, #tpu.memory_space<vmem>>, %arg7: memref<2x32x64xf32, #tpu.memory_space<vmem>>, %arg8: memref<2x1x64xf32, #tpu.memory_space<vmem>>, %arg9: memref<2x64x32xf32, #tpu.memory_space<vmem>>, %arg10: memref<2x1x32xf32, #tpu.memory_space<vmem>>, %arg11: memref<2x32x128xf32, #tpu.memory_space<vmem>>, %arg12: memref<2x1x128xf32, #tpu.memory_space<vmem>>, %arg13: memref<2x128x32xf32, #tpu.memory_space<vmem>>, %arg14: memref<2x1x32xf32, #tpu.memory_space<vmem>>, %arg15: memref<32x10xf32, #tpu.memory_space<vmem>>, %arg16: memref<1x10xf32, #tpu.memory_space<vmem>>, %arg17: memref<10x80xf32, #tpu.memory_space<vmem>>, %arg18: memref<80x10xf32, #tpu.memory_space<vmem>>, %arg19: memref<80x64xf32, #tpu.memory_space<vmem>>, %arg20: memref<80x80xf32, #tpu.memory_space<vmem>>, %arg21: memref<2x10xf32, #tpu.memory_space<vmem>>, %arg22: memref<2x10xf32, #tpu.memory_space<vmem>>) attributes {dimension_semantics = [], scalar_prefetch = 0 : i64, scratch_operands = 0 : i64, tpu.core_type = #tpu.core_type<tc>} {
    %c0 = arith.constant 0 : index
    %c0_0 = arith.constant 0 : index
    %0 = vector.load %arg0[%c0, %c0_0] : memref<10x256xf32, #tpu.memory_space<vmem>>, vector<10x256xf32>
    %c0_1 = arith.constant 0 : index
    %c0_2 = arith.constant 0 : index
    %1 = vector.load %arg1[%c0_1, %c0_2] : memref<256x32xf32, #tpu.memory_space<vmem>>, vector<256x32xf32>
    %cst = arith.constant dense<0.000000e+00> : vector<10x32xf32>
    %2 = tpu.matmul %0, %1, %cst {dimension_numbers = #tpu.dot_dimension_numbers<[1], [0], [0], [1], [0, 0, 1, 1], [], []>} : vector<10x256xf32>, vector<256x32xf32>, vector<10x32xf32> -> vector<10x32xf32>
    %c0_3 = arith.constant 0 : index
    %c0_4 = arith.constant 0 : index
    %3 = vector.load %arg2[%c0_3, %c0_4] : memref<10x32xf32, #tpu.memory_space<vmem>>, vector<10x32xf32>
    %4 = arith.addf %2, %3 : vector<10x32xf32>
    %c0_5 = arith.constant 0 : index
    %c0_6 = arith.constant 0 : index
    %5 = vector.load %arg17[%c0_5, %c0_6] : memref<10x80xf32, #tpu.memory_space<vmem>>, vector<10x80xf32>
    %c0_7 = arith.constant 0 : index
    %c0_8 = arith.constant 0 : index
    %6 = vector.load %arg18[%c0_7, %c0_8] : memref<80x10xf32, #tpu.memory_space<vmem>>, vector<80x10xf32>
    %c0_9 = arith.constant 0 : index
    %c0_10 = arith.constant 0 : index
    %7 = vector.load %arg19[%c0_9, %c0_10] : memref<80x64xf32, #tpu.memory_space<vmem>>, vector<80x64xf32>
    %c0_11 = arith.constant 0 : index
    %c0_12 = arith.constant 0 : index
    %8 = vector.load %arg20[%c0_11, %c0_12] : memref<80x80xf32, #tpu.memory_space<vmem>>, vector<80x80xf32>
    %cst_13 = arith.constant dense<0.000000e+00> : vector<10xf32>
    %9 = vector.multi_reduction <add>, %4, %cst_13 [1] : vector<10x32xf32> to vector<10xf32>
    %10 = vector.shape_cast %9 : vector<10xf32> to vector<10x1xf32>
    %cst_14 = arith.constant 3.200000e+01 : f32
    %11 = vector.broadcast %cst_14 : f32 to vector<10x1xf32>
    %12 = arith.divf %10, %11 : vector<10x1xf32>
    %13 = vector.broadcast %12 : vector<10x1xf32> to vector<10x32xf32>
    %14 = arith.subf %4, %13 : vector<10x32xf32>
    %15 = arith.mulf %14, %14 : vector<10x32xf32>
    %cst_15 = arith.constant dense<0.000000e+00> : vector<10xf32>
    %16 = vector.multi_reduction <add>, %15, %cst_15 [1] : vector<10x32xf32> to vector<10xf32>
    %17 = vector.shape_cast %16 : vector<10xf32> to vector<10x1xf32>
    %cst_16 = arith.constant 3.200000e+01 : f32
    %18 = vector.broadcast %cst_16 : f32 to vector<10x1xf32>
    %19 = arith.divf %17, %18 : vector<10x1xf32>
    %20 = vector.broadcast %12 : vector<10x1xf32> to vector<10x32xf32>
    %21 = arith.subf %4, %20 : vector<10x32xf32>
    %cst_17 = arith.constant 9.99999974E-6 : f32
    %22 = vector.broadcast %cst_17 : f32 to vector<10x1xf32>
    %23 = arith.addf %19, %22 : vector<10x1xf32>
    %24 = math.rsqrt %23 : vector<10x1xf32>
    %25 = vector.broadcast %24 : vector<10x1xf32> to vector<10x32xf32>
    %26 = arith.mulf %21, %25 : vector<10x32xf32>
    %c0_18 = arith.constant 0 : index
    %c0_19 = arith.constant 0 : index
    %c0_20 = arith.constant 0 : index
    %27 = vector.load %arg3[%c0_18, %c0_19, %c0_20] : memref<2x32x64xf32, #tpu.memory_space<vmem>>, vector<1x32x64xf32>
    %28 = vector.shape_cast %27 : vector<1x32x64xf32> to vector<32x64xf32>
    %cst_21 = arith.constant dense<0.000000e+00> : vector<10x64xf32>
    %29 = tpu.matmul %26, %28, %cst_21 {dimension_numbers = #tpu.dot_dimension_numbers<[1], [0], [0], [1], [0, 0, 1, 1], [], []>} : vector<10x32xf32>, vector<32x64xf32>, vector<10x64xf32> -> vector<10x64xf32>
    %c0_22 = arith.constant 0 : index
    %c0_23 = arith.constant 0 : index
    %c0_24 = arith.constant 0 : index
    %30 = vector.load %arg4[%c0_22, %c0_23, %c0_24] : memref<2x1x64xf32, #tpu.memory_space<vmem>>, vector<1x1x64xf32>
    %31 = vector.shape_cast %30 : vector<1x1x64xf32> to vector<1x64xf32>
    %32 = vector.broadcast %31 : vector<1x64xf32> to vector<10x64xf32>
    %33 = arith.addf %29, %32 : vector<10x64xf32>
    %c0_25 = arith.constant 0 : index
    %c0_26 = arith.constant 0 : index
    %c0_27 = arith.constant 0 : index
    %34 = vector.load %arg5[%c0_25, %c0_26, %c0_27] : memref<2x32x64xf32, #tpu.memory_space<vmem>>, vector<1x32x64xf32>
    %35 = vector.shape_cast %34 : vector<1x32x64xf32> to vector<32x64xf32>
    %cst_28 = arith.constant dense<0.000000e+00> : vector<10x64xf32>
    %36 = tpu.matmul %26, %35, %cst_28 {dimension_numbers = #tpu.dot_dimension_numbers<[1], [0], [0], [1], [0, 0, 1, 1], [], []>} : vector<10x32xf32>, vector<32x64xf32>, vector<10x64xf32> -> vector<10x64xf32>
    %c0_29 = arith.constant 0 : index
    %c0_30 = arith.constant 0 : index
    %c0_31 = arith.constant 0 : index
    %37 = vector.load %arg6[%c0_29, %c0_30, %c0_31] : memref<2x1x64xf32, #tpu.memory_space<vmem>>, vector<1x1x64xf32>
    %38 = vector.shape_cast %37 : vector<1x1x64xf32> to vector<1x64xf32>
    %39 = vector.broadcast %38 : vector<1x64xf32> to vector<10x64xf32>
    %40 = arith.addf %36, %39 : vector<10x64xf32>
    %c0_32 = arith.constant 0 : index
    %c0_33 = arith.constant 0 : index
    %c0_34 = arith.constant 0 : index
    %41 = vector.load %arg7[%c0_32, %c0_33, %c0_34] : memref<2x32x64xf32, #tpu.memory_space<vmem>>, vector<1x32x64xf32>
    %42 = vector.shape_cast %41 : vector<1x32x64xf32> to vector<32x64xf32>
    %cst_35 = arith.constant dense<0.000000e+00> : vector<10x64xf32>
    %43 = tpu.matmul %26, %42, %cst_35 {dimension_numbers = #tpu.dot_dimension_numbers<[1], [0], [0], [1], [0, 0, 1, 1], [], []>} : vector<10x32xf32>, vector<32x64xf32>, vector<10x64xf32> -> vector<10x64xf32>
    %c0_36 = arith.constant 0 : index
    %c0_37 = arith.constant 0 : index
    %c0_38 = arith.constant 0 : index
    %44 = vector.load %arg8[%c0_36, %c0_37, %c0_38] : memref<2x1x64xf32, #tpu.memory_space<vmem>>, vector<1x1x64xf32>
    %45 = vector.shape_cast %44 : vector<1x1x64xf32> to vector<1x64xf32>
    %46 = vector.broadcast %45 : vector<1x64xf32> to vector<10x64xf32>
    %47 = arith.addf %43, %46 : vector<10x64xf32>
    %cst_39 = arith.constant dense<0.000000e+00> : vector<80x64xf32>
    %48 = tpu.matmul %6, %40, %cst_39 {dimension_numbers = #tpu.dot_dimension_numbers<[1], [0], [0], [1], [0, 0, 1, 1], [], []>} : vector<80x10xf32>, vector<10x64xf32>, vector<80x64xf32> -> vector<80x64xf32>
    %49 = arith.mulf %48, %7 : vector<80x64xf32>
    %cst_40 = arith.constant dense<0.000000e+00> : vector<80x64xf32>
    %50 = tpu.matmul %6, %47, %cst_40 {dimension_numbers = #tpu.dot_dimension_numbers<[1], [0], [0], [1], [0, 0, 1, 1], [], []>} : vector<80x10xf32>, vector<10x64xf32>, vector<80x64xf32> -> vector<80x64xf32>
    %51 = arith.mulf %50, %7 : vector<80x64xf32>
    "tpu.trace_start"() <{level = 10 : i32, message = "nd,md->nm"}> : () -> ()
    %cst_41 = arith.constant dense<0.000000e+00> : vector<10x80xf32>
    %52 = tpu.matmul %33, %49, %cst_41 {dimension_numbers = #tpu.dot_dimension_numbers<[1], [1], [0], [0], [0, 0, 1, 0], [], []>} : vector<10x64xf32>, vector<80x64xf32>, vector<10x80xf32> -> vector<10x80xf32>
    "tpu.trace_stop"() : () -> ()
    %53 = arith.addf %52, %5 : vector<10x80xf32>
    %cst_42 = arith.constant dense<0xFF800000> : vector<10xf32>
    %54 = vector.multi_reduction <maximumf>, %53, %cst_42 [1] : vector<10x80xf32> to vector<10xf32>
    %55 = vector.shape_cast %54 : vector<10xf32> to vector<10x1xf32>
    %56 = vector.broadcast %55 : vector<10x1xf32> to vector<10x80xf32>
    %57 = arith.subf %53, %56 : vector<10x80xf32>
    %58 = math.exp %57 : vector<10x80xf32>
    %cst_43 = arith.constant dense<0.000000e+00> : vector<10x80xf32>
    %59 = tpu.matmul %58, %8, %cst_43 {dimension_numbers = #tpu.dot_dimension_numbers<[1], [0], [0], [1], [0, 0, 1, 1], [], []>} : vector<10x80xf32>, vector<80x80xf32>, vector<10x80xf32> -> vector<10x80xf32>
    %60 = arith.divf %58, %59 : vector<10x80xf32>
    %cst_44 = arith.constant dense<0.000000e+00> : vector<10x64xf32>
    %61 = tpu.matmul %60, %51, %cst_44 {dimension_numbers = #tpu.dot_dimension_numbers<[1], [0], [0], [1], [0, 0, 1, 1], [], []>} : vector<10x80xf32>, vector<80x64xf32>, vector<10x64xf32> -> vector<10x64xf32>
    %c0_45 = arith.constant 0 : index
    %c0_46 = arith.constant 0 : index
    %c0_47 = arith.constant 0 : index
    %62 = vector.load %arg9[%c0_45, %c0_46, %c0_47] : memref<2x64x32xf32, #tpu.memory_space<vmem>>, vector<1x64x32xf32>
    %63 = vector.shape_cast %62 : vector<1x64x32xf32> to vector<64x32xf32>
    %cst_48 = arith.constant dense<0.000000e+00> : vector<10x32xf32>
    %64 = tpu.matmul %61, %63, %cst_48 {dimension_numbers = #tpu.dot_dimension_numbers<[1], [0], [0], [1], [0, 0, 1, 1], [], []>} : vector<10x64xf32>, vector<64x32xf32>, vector<10x32xf32> -> vector<10x32xf32>
    %65 = arith.addf %4, %64 : vector<10x32xf32>
    %c0_49 = arith.constant 0 : index
    %c0_50 = arith.constant 0 : index
    %c0_51 = arith.constant 0 : index
    %66 = vector.load %arg10[%c0_49, %c0_50, %c0_51] : memref<2x1x32xf32, #tpu.memory_space<vmem>>, vector<1x1x32xf32>
    %67 = vector.shape_cast %66 : vector<1x1x32xf32> to vector<1x32xf32>
    %68 = vector.broadcast %67 : vector<1x32xf32> to vector<10x32xf32>
    %69 = arith.addf %65, %68 : vector<10x32xf32>
    %cst_52 = arith.constant dense<0.000000e+00> : vector<10xf32>
    %70 = vector.multi_reduction <add>, %69, %cst_52 [1] : vector<10x32xf32> to vector<10xf32>
    %71 = vector.shape_cast %70 : vector<10xf32> to vector<10x1xf32>
    %cst_53 = arith.constant 3.200000e+01 : f32
    %72 = vector.broadcast %cst_53 : f32 to vector<10x1xf32>
    %73 = arith.divf %71, %72 : vector<10x1xf32>
    %74 = vector.broadcast %73 : vector<10x1xf32> to vector<10x32xf32>
    %75 = arith.subf %69, %74 : vector<10x32xf32>
    %76 = arith.mulf %75, %75 : vector<10x32xf32>
    %cst_54 = arith.constant dense<0.000000e+00> : vector<10xf32>
    %77 = vector.multi_reduction <add>, %76, %cst_54 [1] : vector<10x32xf32> to vector<10xf32>
    %78 = vector.shape_cast %77 : vector<10xf32> to vector<10x1xf32>
    %cst_55 = arith.constant 3.200000e+01 : f32
    %79 = vector.broadcast %cst_55 : f32 to vector<10x1xf32>
    %80 = arith.divf %78, %79 : vector<10x1xf32>
    %81 = vector.broadcast %73 : vector<10x1xf32> to vector<10x32xf32>
    %82 = arith.subf %69, %81 : vector<10x32xf32>
    %cst_56 = arith.constant 9.99999974E-6 : f32
    %83 = vector.broadcast %cst_56 : f32 to vector<10x1xf32>
    %84 = arith.addf %80, %83 : vector<10x1xf32>
    %85 = math.rsqrt %84 : vector<10x1xf32>
    %86 = vector.broadcast %85 : vector<10x1xf32> to vector<10x32xf32>
    %87 = arith.mulf %82, %86 : vector<10x32xf32>
    %c0_57 = arith.constant 0 : index
    %c0_58 = arith.constant 0 : index
    %c0_59 = arith.constant 0 : index
    %88 = vector.load %arg11[%c0_57, %c0_58, %c0_59] : memref<2x32x128xf32, #tpu.memory_space<vmem>>, vector<1x32x128xf32>
    %89 = vector.shape_cast %88 : vector<1x32x128xf32> to vector<32x128xf32>
    %cst_60 = arith.constant dense<0.000000e+00> : vector<10x128xf32>
    %90 = tpu.matmul %87, %89, %cst_60 {dimension_numbers = #tpu.dot_dimension_numbers<[1], [0], [0], [1], [0, 0, 1, 1], [], []>} : vector<10x32xf32>, vector<32x128xf32>, vector<10x128xf32> -> vector<10x128xf32>
    %c0_61 = arith.constant 0 : index
    %c0_62 = arith.constant 0 : index
    %c0_63 = arith.constant 0 : index
    %91 = vector.load %arg12[%c0_61, %c0_62, %c0_63] : memref<2x1x128xf32, #tpu.memory_space<vmem>>, vector<1x1x128xf32>
    %92 = vector.shape_cast %91 : vector<1x1x128xf32> to vector<1x128xf32>
    %93 = vector.broadcast %92 : vector<1x128xf32> to vector<10x128xf32>
    %94 = arith.addf %90, %93 : vector<10x128xf32>
    %cst_64 = arith.constant 5.000000e-01 : f32
    %95 = vector.broadcast %cst_64 : f32 to vector<10x128xf32>
    %96 = arith.mulf %95, %94 : vector<10x128xf32>
    %cst_65 = arith.constant 0.707106769 : f32
    %97 = vector.broadcast %cst_65 : f32 to vector<10x128xf32>
    %98 = arith.mulf %94, %97 : vector<10x128xf32>
    %99 = math.erf %98 : vector<10x128xf32>
    %cst_66 = arith.constant 1.000000e+00 : f32
    %100 = vector.broadcast %cst_66 : f32 to vector<10x128xf32>
    %101 = arith.addf %100, %99 : vector<10x128xf32>
    %102 = arith.mulf %96, %101 : vector<10x128xf32>
    %c0_67 = arith.constant 0 : index
    %c0_68 = arith.constant 0 : index
    %c0_69 = arith.constant 0 : index
    %103 = vector.load %arg13[%c0_67, %c0_68, %c0_69] : memref<2x128x32xf32, #tpu.memory_space<vmem>>, vector<1x128x32xf32>
    %104 = vector.shape_cast %103 : vector<1x128x32xf32> to vector<128x32xf32>
    %cst_70 = arith.constant dense<0.000000e+00> : vector<10x32xf32>
    %105 = tpu.matmul %102, %104, %cst_70 {dimension_numbers = #tpu.dot_dimension_numbers<[1], [0], [0], [1], [0, 0, 1, 1], [], []>} : vector<10x128xf32>, vector<128x32xf32>, vector<10x32xf32> -> vector<10x32xf32>
    %106 = arith.addf %69, %105 : vector<10x32xf32>
    %c0_71 = arith.constant 0 : index
    %c0_72 = arith.constant 0 : index
    %c0_73 = arith.constant 0 : index
    %107 = vector.load %arg14[%c0_71, %c0_72, %c0_73] : memref<2x1x32xf32, #tpu.memory_space<vmem>>, vector<1x1x32xf32>
    %108 = vector.shape_cast %107 : vector<1x1x32xf32> to vector<1x32xf32>
    %109 = vector.broadcast %108 : vector<1x32xf32> to vector<10x32xf32>
    %110 = arith.addf %106, %109 : vector<10x32xf32>
    %cst_74 = arith.constant dense<0.000000e+00> : vector<10xf32>
    %111 = vector.multi_reduction <add>, %110, %cst_74 [1] : vector<10x32xf32> to vector<10xf32>
    %112 = vector.shape_cast %111 : vector<10xf32> to vector<10x1xf32>
    %cst_75 = arith.constant 3.200000e+01 : f32
    %113 = vector.broadcast %cst_75 : f32 to vector<10x1xf32>
    %114 = arith.divf %112, %113 : vector<10x1xf32>
    %115 = vector.broadcast %114 : vector<10x1xf32> to vector<10x32xf32>
    %116 = arith.subf %110, %115 : vector<10x32xf32>
    %117 = arith.mulf %116, %116 : vector<10x32xf32>
    %cst_76 = arith.constant dense<0.000000e+00> : vector<10xf32>
    %118 = vector.multi_reduction <add>, %117, %cst_76 [1] : vector<10x32xf32> to vector<10xf32>
    %119 = vector.shape_cast %118 : vector<10xf32> to vector<10x1xf32>
    %cst_77 = arith.constant 3.200000e+01 : f32
    %120 = vector.broadcast %cst_77 : f32 to vector<10x1xf32>
    %121 = arith.divf %119, %120 : vector<10x1xf32>
    %122 = vector.broadcast %114 : vector<10x1xf32> to vector<10x32xf32>
    %123 = arith.subf %110, %122 : vector<10x32xf32>
    %cst_78 = arith.constant 9.99999974E-6 : f32
    %124 = vector.broadcast %cst_78 : f32 to vector<10x1xf32>
    %125 = arith.addf %121, %124 : vector<10x1xf32>
    %126 = math.rsqrt %125 : vector<10x1xf32>
    %127 = vector.broadcast %126 : vector<10x1xf32> to vector<10x32xf32>
    %128 = arith.mulf %123, %127 : vector<10x32xf32>
    %c1 = arith.constant 1 : index
    %c0_79 = arith.constant 0 : index
    %c0_80 = arith.constant 0 : index
    %129 = vector.load %arg3[%c1, %c0_79, %c0_80] : memref<2x32x64xf32, #tpu.memory_space<vmem>>, vector<1x32x64xf32>
    %130 = vector.shape_cast %129 : vector<1x32x64xf32> to vector<32x64xf32>
    %cst_81 = arith.constant dense<0.000000e+00> : vector<10x64xf32>
    %131 = tpu.matmul %128, %130, %cst_81 {dimension_numbers = #tpu.dot_dimension_numbers<[1], [0], [0], [1], [0, 0, 1, 1], [], []>} : vector<10x32xf32>, vector<32x64xf32>, vector<10x64xf32> -> vector<10x64xf32>
    %c1_82 = arith.constant 1 : index
    %c0_83 = arith.constant 0 : index
    %c0_84 = arith.constant 0 : index
    %132 = vector.load %arg4[%c1_82, %c0_83, %c0_84] : memref<2x1x64xf32, #tpu.memory_space<vmem>>, vector<1x1x64xf32>
    %133 = vector.shape_cast %132 : vector<1x1x64xf32> to vector<1x64xf32>
    %134 = vector.broadcast %133 : vector<1x64xf32> to vector<10x64xf32>
    %135 = arith.addf %131, %134 : vector<10x64xf32>
    %c1_85 = arith.constant 1 : index
    %c0_86 = arith.constant 0 : index
    %c0_87 = arith.constant 0 : index
    %136 = vector.load %arg5[%c1_85, %c0_86, %c0_87] : memref<2x32x64xf32, #tpu.memory_space<vmem>>, vector<1x32x64xf32>
    %137 = vector.shape_cast %136 : vector<1x32x64xf32> to vector<32x64xf32>
    %cst_88 = arith.constant dense<0.000000e+00> : vector<10x64xf32>
    %138 = tpu.matmul %128, %137, %cst_88 {dimension_numbers = #tpu.dot_dimension_numbers<[1], [0], [0], [1], [0, 0, 1, 1], [], []>} : vector<10x32xf32>, vector<32x64xf32>, vector<10x64xf32> -> vector<10x64xf32>
    %c1_89 = arith.constant 1 : index
    %c0_90 = arith.constant 0 : index
    %c0_91 = arith.constant 0 : index
    %139 = vector.load %arg6[%c1_89, %c0_90, %c0_91] : memref<2x1x64xf32, #tpu.memory_space<vmem>>, vector<1x1x64xf32>
    %140 = vector.shape_cast %139 : vector<1x1x64xf32> to vector<1x64xf32>
    %141 = vector.broadcast %140 : vector<1x64xf32> to vector<10x64xf32>
    %142 = arith.addf %138, %141 : vector<10x64xf32>
    %c1_92 = arith.constant 1 : index
    %c0_93 = arith.constant 0 : index
    %c0_94 = arith.constant 0 : index
    %143 = vector.load %arg7[%c1_92, %c0_93, %c0_94] : memref<2x32x64xf32, #tpu.memory_space<vmem>>, vector<1x32x64xf32>
    %144 = vector.shape_cast %143 : vector<1x32x64xf32> to vector<32x64xf32>
    %cst_95 = arith.constant dense<0.000000e+00> : vector<10x64xf32>
    %145 = tpu.matmul %128, %144, %cst_95 {dimension_numbers = #tpu.dot_dimension_numbers<[1], [0], [0], [1], [0, 0, 1, 1], [], []>} : vector<10x32xf32>, vector<32x64xf32>, vector<10x64xf32> -> vector<10x64xf32>
    %c1_96 = arith.constant 1 : index
    %c0_97 = arith.constant 0 : index
    %c0_98 = arith.constant 0 : index
    %146 = vector.load %arg8[%c1_96, %c0_97, %c0_98] : memref<2x1x64xf32, #tpu.memory_space<vmem>>, vector<1x1x64xf32>
    %147 = vector.shape_cast %146 : vector<1x1x64xf32> to vector<1x64xf32>
    %148 = vector.broadcast %147 : vector<1x64xf32> to vector<10x64xf32>
    %149 = arith.addf %145, %148 : vector<10x64xf32>
    %cst_99 = arith.constant dense<0.000000e+00> : vector<80x64xf32>
    %150 = tpu.matmul %6, %142, %cst_99 {dimension_numbers = #tpu.dot_dimension_numbers<[1], [0], [0], [1], [0, 0, 1, 1], [], []>} : vector<80x10xf32>, vector<10x64xf32>, vector<80x64xf32> -> vector<80x64xf32>
    %151 = arith.mulf %150, %7 : vector<80x64xf32>
    %cst_100 = arith.constant dense<0.000000e+00> : vector<80x64xf32>
    %152 = tpu.matmul %6, %149, %cst_100 {dimension_numbers = #tpu.dot_dimension_numbers<[1], [0], [0], [1], [0, 0, 1, 1], [], []>} : vector<80x10xf32>, vector<10x64xf32>, vector<80x64xf32> -> vector<80x64xf32>
    %153 = arith.mulf %152, %7 : vector<80x64xf32>
    "tpu.trace_start"() <{level = 10 : i32, message = "nd,md->nm"}> : () -> ()
    %cst_101 = arith.constant dense<0.000000e+00> : vector<10x80xf32>
    %154 = tpu.matmul %135, %151, %cst_101 {dimension_numbers = #tpu.dot_dimension_numbers<[1], [1], [0], [0], [0, 0, 1, 0], [], []>} : vector<10x64xf32>, vector<80x64xf32>, vector<10x80xf32> -> vector<10x80xf32>
    "tpu.trace_stop"() : () -> ()
    %155 = arith.addf %154, %5 : vector<10x80xf32>
    %cst_102 = arith.constant dense<0xFF800000> : vector<10xf32>
    %156 = vector.multi_reduction <maximumf>, %155, %cst_102 [1] : vector<10x80xf32> to vector<10xf32>
    %157 = vector.shape_cast %156 : vector<10xf32> to vector<10x1xf32>
    %158 = vector.broadcast %157 : vector<10x1xf32> to vector<10x80xf32>
    %159 = arith.subf %155, %158 : vector<10x80xf32>
    %160 = math.exp %159 : vector<10x80xf32>
    %cst_103 = arith.constant dense<0.000000e+00> : vector<10x80xf32>
    %161 = tpu.matmul %160, %8, %cst_103 {dimension_numbers = #tpu.dot_dimension_numbers<[1], [0], [0], [1], [0, 0, 1, 1], [], []>} : vector<10x80xf32>, vector<80x80xf32>, vector<10x80xf32> -> vector<10x80xf32>
    %162 = arith.divf %160, %161 : vector<10x80xf32>
    %cst_104 = arith.constant dense<0.000000e+00> : vector<10x64xf32>
    %163 = tpu.matmul %162, %153, %cst_104 {dimension_numbers = #tpu.dot_dimension_numbers<[1], [0], [0], [1], [0, 0, 1, 1], [], []>} : vector<10x80xf32>, vector<80x64xf32>, vector<10x64xf32> -> vector<10x64xf32>
    %c1_105 = arith.constant 1 : index
    %c0_106 = arith.constant 0 : index
    %c0_107 = arith.constant 0 : index
    %164 = vector.load %arg9[%c1_105, %c0_106, %c0_107] : memref<2x64x32xf32, #tpu.memory_space<vmem>>, vector<1x64x32xf32>
    %165 = vector.shape_cast %164 : vector<1x64x32xf32> to vector<64x32xf32>
    %cst_108 = arith.constant dense<0.000000e+00> : vector<10x32xf32>
    %166 = tpu.matmul %163, %165, %cst_108 {dimension_numbers = #tpu.dot_dimension_numbers<[1], [0], [0], [1], [0, 0, 1, 1], [], []>} : vector<10x64xf32>, vector<64x32xf32>, vector<10x32xf32> -> vector<10x32xf32>
    %167 = arith.addf %110, %166 : vector<10x32xf32>
    %c1_109 = arith.constant 1 : index
    %c0_110 = arith.constant 0 : index
    %c0_111 = arith.constant 0 : index
    %168 = vector.load %arg10[%c1_109, %c0_110, %c0_111] : memref<2x1x32xf32, #tpu.memory_space<vmem>>, vector<1x1x32xf32>
    %169 = vector.shape_cast %168 : vector<1x1x32xf32> to vector<1x32xf32>
    %170 = vector.broadcast %169 : vector<1x32xf32> to vector<10x32xf32>
    %171 = arith.addf %167, %170 : vector<10x32xf32>
    %cst_112 = arith.constant dense<0.000000e+00> : vector<10xf32>
    %172 = vector.multi_reduction <add>, %171, %cst_112 [1] : vector<10x32xf32> to vector<10xf32>
    %173 = vector.shape_cast %172 : vector<10xf32> to vector<10x1xf32>
    %cst_113 = arith.constant 3.200000e+01 : f32
    %174 = vector.broadcast %cst_113 : f32 to vector<10x1xf32>
    %175 = arith.divf %173, %174 : vector<10x1xf32>
    %176 = vector.broadcast %175 : vector<10x1xf32> to vector<10x32xf32>
    %177 = arith.subf %171, %176 : vector<10x32xf32>
    %178 = arith.mulf %177, %177 : vector<10x32xf32>
    %cst_114 = arith.constant dense<0.000000e+00> : vector<10xf32>
    %179 = vector.multi_reduction <add>, %178, %cst_114 [1] : vector<10x32xf32> to vector<10xf32>
    %180 = vector.shape_cast %179 : vector<10xf32> to vector<10x1xf32>
    %cst_115 = arith.constant 3.200000e+01 : f32
    %181 = vector.broadcast %cst_115 : f32 to vector<10x1xf32>
    %182 = arith.divf %180, %181 : vector<10x1xf32>
    %183 = vector.broadcast %175 : vector<10x1xf32> to vector<10x32xf32>
    %184 = arith.subf %171, %183 : vector<10x32xf32>
    %cst_116 = arith.constant 9.99999974E-6 : f32
    %185 = vector.broadcast %cst_116 : f32 to vector<10x1xf32>
    %186 = arith.addf %182, %185 : vector<10x1xf32>
    %187 = math.rsqrt %186 : vector<10x1xf32>
    %188 = vector.broadcast %187 : vector<10x1xf32> to vector<10x32xf32>
    %189 = arith.mulf %184, %188 : vector<10x32xf32>
    %c1_117 = arith.constant 1 : index
    %c0_118 = arith.constant 0 : index
    %c0_119 = arith.constant 0 : index
    %190 = vector.load %arg11[%c1_117, %c0_118, %c0_119] : memref<2x32x128xf32, #tpu.memory_space<vmem>>, vector<1x32x128xf32>
    %191 = vector.shape_cast %190 : vector<1x32x128xf32> to vector<32x128xf32>
    %cst_120 = arith.constant dense<0.000000e+00> : vector<10x128xf32>
    %192 = tpu.matmul %189, %191, %cst_120 {dimension_numbers = #tpu.dot_dimension_numbers<[1], [0], [0], [1], [0, 0, 1, 1], [], []>} : vector<10x32xf32>, vector<32x128xf32>, vector<10x128xf32> -> vector<10x128xf32>
    %c1_121 = arith.constant 1 : index
    %c0_122 = arith.constant 0 : index
    %c0_123 = arith.constant 0 : index
    %193 = vector.load %arg12[%c1_121, %c0_122, %c0_123] : memref<2x1x128xf32, #tpu.memory_space<vmem>>, vector<1x1x128xf32>
    %194 = vector.shape_cast %193 : vector<1x1x128xf32> to vector<1x128xf32>
    %195 = vector.broadcast %194 : vector<1x128xf32> to vector<10x128xf32>
    %196 = arith.addf %192, %195 : vector<10x128xf32>
    %cst_124 = arith.constant 5.000000e-01 : f32
    %197 = vector.broadcast %cst_124 : f32 to vector<10x128xf32>
    %198 = arith.mulf %197, %196 : vector<10x128xf32>
    %cst_125 = arith.constant 0.707106769 : f32
    %199 = vector.broadcast %cst_125 : f32 to vector<10x128xf32>
    %200 = arith.mulf %196, %199 : vector<10x128xf32>
    %201 = math.erf %200 : vector<10x128xf32>
    %cst_126 = arith.constant 1.000000e+00 : f32
    %202 = vector.broadcast %cst_126 : f32 to vector<10x128xf32>
    %203 = arith.addf %202, %201 : vector<10x128xf32>
    %204 = arith.mulf %198, %203 : vector<10x128xf32>
    %c1_127 = arith.constant 1 : index
    %c0_128 = arith.constant 0 : index
    %c0_129 = arith.constant 0 : index
    %205 = vector.load %arg13[%c1_127, %c0_128, %c0_129] : memref<2x128x32xf32, #tpu.memory_space<vmem>>, vector<1x128x32xf32>
    %206 = vector.shape_cast %205 : vector<1x128x32xf32> to vector<128x32xf32>
    %cst_130 = arith.constant dense<0.000000e+00> : vector<10x32xf32>
    %207 = tpu.matmul %204, %206, %cst_130 {dimension_numbers = #tpu.dot_dimension_numbers<[1], [0], [0], [1], [0, 0, 1, 1], [], []>} : vector<10x128xf32>, vector<128x32xf32>, vector<10x32xf32> -> vector<10x32xf32>
    %208 = arith.addf %171, %207 : vector<10x32xf32>
    %c1_131 = arith.constant 1 : index
    %c0_132 = arith.constant 0 : index
    %c0_133 = arith.constant 0 : index
    %209 = vector.load %arg14[%c1_131, %c0_132, %c0_133] : memref<2x1x32xf32, #tpu.memory_space<vmem>>, vector<1x1x32xf32>
    %210 = vector.shape_cast %209 : vector<1x1x32xf32> to vector<1x32xf32>
    %211 = vector.broadcast %210 : vector<1x32xf32> to vector<10x32xf32>
    %212 = arith.addf %208, %211 : vector<10x32xf32>
    %c0_134 = arith.constant 0 : index
    %c0_135 = arith.constant 0 : index
    %213 = vector.load %arg21[%c0_134, %c0_135] : memref<2x10xf32, #tpu.memory_space<vmem>>, vector<2x10xf32>
    %cst_136 = arith.constant dense<0.000000e+00> : vector<2x32xf32>
    %214 = tpu.matmul %213, %212, %cst_136 {dimension_numbers = #tpu.dot_dimension_numbers<[1], [0], [0], [1], [0, 0, 1, 1], [], []>} : vector<2x10xf32>, vector<10x32xf32>, vector<2x32xf32> -> vector<2x32xf32>
    %cst_137 = arith.constant dense<0.000000e+00> : vector<2xf32>
    %215 = vector.multi_reduction <add>, %214, %cst_137 [1] : vector<2x32xf32> to vector<2xf32>
    %216 = vector.shape_cast %215 : vector<2xf32> to vector<2x1xf32>
    %cst_138 = arith.constant 3.200000e+01 : f32
    %217 = vector.broadcast %cst_138 : f32 to vector<2x1xf32>
    %218 = arith.divf %216, %217 : vector<2x1xf32>
    %219 = vector.broadcast %218 : vector<2x1xf32> to vector<2x32xf32>
    %220 = arith.subf %214, %219 : vector<2x32xf32>
    %221 = arith.mulf %220, %220 : vector<2x32xf32>
    %cst_139 = arith.constant dense<0.000000e+00> : vector<2xf32>
    %222 = vector.multi_reduction <add>, %221, %cst_139 [1] : vector<2x32xf32> to vector<2xf32>
    %223 = vector.shape_cast %222 : vector<2xf32> to vector<2x1xf32>
    %cst_140 = arith.constant 3.200000e+01 : f32
    %224 = vector.broadcast %cst_140 : f32 to vector<2x1xf32>
    %225 = arith.divf %223, %224 : vector<2x1xf32>
    %226 = vector.broadcast %218 : vector<2x1xf32> to vector<2x32xf32>
    %227 = arith.subf %214, %226 : vector<2x32xf32>
    %cst_141 = arith.constant 9.99999974E-6 : f32
    %228 = vector.broadcast %cst_141 : f32 to vector<2x1xf32>
    %229 = arith.addf %225, %228 : vector<2x1xf32>
    %230 = math.rsqrt %229 : vector<2x1xf32>
    %231 = vector.broadcast %230 : vector<2x1xf32> to vector<2x32xf32>
    %232 = arith.mulf %227, %231 : vector<2x32xf32>
    %c0_142 = arith.constant 0 : index
    %c0_143 = arith.constant 0 : index
    %233 = vector.load %arg15[%c0_142, %c0_143] : memref<32x10xf32, #tpu.memory_space<vmem>>, vector<32x10xf32>
    %cst_144 = arith.constant dense<0.000000e+00> : vector<2x10xf32>
    %234 = tpu.matmul %232, %233, %cst_144 {dimension_numbers = #tpu.dot_dimension_numbers<[1], [0], [0], [1], [0, 0, 1, 1], [], []>} : vector<2x32xf32>, vector<32x10xf32>, vector<2x10xf32> -> vector<2x10xf32>
    %c0_145 = arith.constant 0 : index
    %c0_146 = arith.constant 0 : index
    %235 = vector.load %arg16[%c0_145, %c0_146] : memref<1x10xf32, #tpu.memory_space<vmem>>, vector<1x10xf32>
    %236 = vector.broadcast %235 : vector<1x10xf32> to vector<2x10xf32>
    %237 = arith.addf %234, %236 : vector<2x10xf32>
    %c0_147 = arith.constant 0 : index
    %c0_148 = arith.constant 0 : index
    %238 = vector.load %arg22[%c0_147, %c0_148] : memref<2x10xf32, #tpu.memory_space<vmem>>, vector<2x10xf32>
    tpu.vector_store %arg22[%c0_147, %c0_148], %237 {strides = array<i32>} : memref<2x10xf32, #tpu.memory_space<vmem>>, vector<2x10xf32>,
    return
  }
}

</mosaic_0001>

<bundles_post_ra>
// kernel: vit_forward.1
= control target key start
LH: loop header
LB: loop body
LE: loop exit
PB: predicated region body
PF: predicated region fallthrough
CT: control target
= control target key end

     0   :  { %s5084_s0 = inlined_call_operand.vmem [shape: f32[10,256], index: 0, kind: input, shape index: {}]   ;;  %s5085_s1 = inlined_call_operand.vmem [shape: f32[256,32], index: 1, kind: input, shape index: {}]   ;;  %s5086_s2 = inlined_call_operand.vmem [shape: f32[10,32], index: 2, kind: input, shape index: {}]   ;;  %s5087_s3 = inlined_call_operand.vmem [shape: f32[2,32,64], index: 3, kind: input, shape index: {}]   ;;  %s5088_s4 = inlined_call_operand.vmem [shape: f32[2,1,64], index: 4, kind: input, shape index: {}]   ;;  %s5089_s5 = inlined_call_operand.vmem [shape: f32[2,32,64], index: 5, kind: input, shape index: {}]   ;;  %s5090_s6 = inlined_call_operand.vmem [shape: f32[2,1,64], index: 6, kind: input, shape index: {}]   ;;  %s5091_s7 = inlined_call_operand.vmem [shape: f32[2,32,64], index: 7, kind: input, shape index: {}]   ;;  %s5092_s8 = inlined_call_operand.vmem [shape: f32[2,1,64], index: 8, kind: input, shape index: {}]   ;;  %s5093_s9 = inlined_call_operand.vmem [shape: f32[2,64,32], index: 9, kind: input, shape index: {}]   ;;  %s5094_s10 = inlined_call_operand.vmem [shape: f32[2,1,32], index: 10, kind: input, shape index: {}]   ;;  %s5095_s11 = inlined_call_operand.vmem [shape: f32[2,32,128], index: 11, kind: input, shape index: {}]   ;;  %s5096_s12 = inlined_call_operand.vmem [shape: f32[2,1,128], index: 12, kind: input, shape index: {}]   ;;  %s5097_s13 = inlined_call_operand.vmem [shape: f32[2,128,32], index: 13, kind: input, shape index: {}]   ;;  %s5098_s14 = inlined_call_operand.vmem [shape: f32[2,1,32], index: 14, kind: input, shape index: {}]   ;;  %s5099_s15 = inlined_call_operand.vmem [shape: f32[32,10], index: 15, kind: input, shape index: {}]   ;;  %s5100_s16 = inlined_call_operand.vmem [shape: f32[1,10], index: 16, kind: input, shape index: {}]   ;;  %s5101_s17 = inlined_call_operand.vmem [shape: f32[10,80], index: 17, kind: input, shape index: {}]   ;;  %s5102_s18 = inlined_call_operand.vmem [shape: f32[80,10], index: 18, kind: input, shape index: {}]   ;;  %s5103_s19 = inlined_call_operand.vmem [shape: f32[80,64], index: 19, kind: input, shape index: {}]   ;;  %s5104_s20 = inlined_call_operand.vmem [shape: f32[80,80], index: 20, kind: input, shape index: {}]   ;;  %s5105_s21 = inlined_call_operand.vmem [shape: f32[2,10], index: 21, kind: input, shape index: {}]   ;;  %s5106_s22 = inlined_call_operand.hbm [shape: f32[2,10], index: 22, kind: output, shape index: {}]  }
   0x1   :  { %5114 = sst [smem:[#allocation5_spill]] %s5084_s0 }
   0x2   :  { %5115 = sst [smem:[#allocation6_spill]] %s5085_s1 }
   0x3   :  { %5116 = sst [smem:[#allocation7_spill]] %s5086_s2 }
   0x4   :  { %5117 = sst [smem:[#allocation8_spill]] %s5087_s3 }
   0x5   :  { %5118 = sst [smem:[#allocation9_spill]] %s5088_s4 }
   0x6   :  { %5119 = sst [smem:[#allocation10_spill]] %s5089_s5 }
   0x7   :  { %5120 = sst [smem:[#allocation11_spill]] %s5090_s6 }
   0x8   :  { %s5121_s29 = sld [smem:[#allocation6_spill]]  ;;  %s5122_s25 = sld [smem:[#allocation5_spill]] }
   0xe   :  { %v92_v0 = vld [vmem:[%s5121_s29 + $0x80] sm:$0xff]  ;;  %v93_v1 = vld [vmem:[%s5121_s29 + $0x88] sm:$0xff]  ;;  %v94_v5 = vld [vmem:[%s5121_s29 + $0x90] sm:$0xff] }
   0xf   :  { %v76_v2 = vld [vmem:[%s5121_s29] sm:$0xff]  ;;  %v3643_v3 = vpack.c.bf16 %v93_v1, %v92_v0  ;;  %v77_v4 = vld [vmem:[%s5121_s29 + $0x8] sm:$0xff]  ;;  %v95_v6 = vld [vmem:[%s5121_s29 + $0x98] sm:$0xff] }
  0x10   :  { %v3645_v7 = vpack.c.bf16 %v77_v4, %v76_v2  ;;  %v3647_v8 = vpack.c.bf16 %v95_v6, %v94_v5  ;;  %v78_v9 = vld [vmem:[%s5121_s29 + $0x10] sm:$0xff]  ;;  %v79_v10 = vld [vmem:[%s5121_s29 + $0x18] sm:$0xff]  ;;  %v96_v11 = vld [vmem:[%s5121_s29 + $0xa0] sm:$0xff] }
  0x11   :  { %3644 = vmatprep.subr.bf16.mxu0 %v3643_v3  ;;  %v97_v12 = vld [vmem:[%s5121_s29 + $0xa8] sm:$0xff]  ;;  %v3649_v13 = vpack.c.bf16 %v79_v10, %v78_v9  ;;  %v80_v15 = vld [vmem:[%s5121_s29 + $0x20] sm:$0xff]  ;;  %v98_v17 = vld [vmem:[%s5121_s29 + $0xb0] sm:$0xff] }
  0x12   :  { %3646 = vmatpush3.bf16.msra.mxu0 %v3645_v7  ;;  %v3651_v14 = vpack.c.bf16 %v97_v12, %v96_v11  ;;  %v81_v16 = vld [vmem:[%s5121_s29 + $0x28] sm:$0xff]  ;;  %v99_v18 = vld [vmem:[%s5121_s29 + $0xb8] sm:$0xff]  ;;  %v82_v21 = vld [vmem:[%s5121_s29 + $0x30] sm:$0xff] }
  0x13   :  { %3648 = vmatprep.subr.bf16.mxu0 %v3647_v8  ;;  %v3653_v19 = vpack.c.bf16 %v81_v16, %v80_v15  ;;  %v3655_v20 = vpack.c.bf16 %v99_v18, %v98_v17  ;;  %v83_v22 = vld [vmem:[%s5121_s29 + $0x38] sm:$0xff]  ;;  %v100_v23 = vld [vmem:[%s5121_s29 + $0xc0] sm:$0xff]  ;;  %v101_v24 = vld [vmem:[%s5121_s29 + $0xc8] sm:$0xff] }
  0x14   :  { %v73_v25 = vld [vmem:[%s5122_s25 + $0x8] sm:$0xff]  ;;  %v3657_v26 = vpack.c.bf16 %v83_v22, %v82_v21 }
  0x15   :  { %174 = vmatprep.mubr.f32.mxu0 %v73_v25 }
  0x16   :  { %3650 = vmatpush3.bf16.msra.mxu0 %v3649_v13 }
  0x17   :  { %3652 = vmatprep.subr.bf16.mxu0 %v3651_v14 }
  0x1a   :  { %3654 = vmatpush3.bf16.msra.mxu0 %v3653_v19 }
  0x1b   :  { %27 = vsyncpa [#allocation3], 0  ;;  %3656 = vmatprep.subr.bf16.mxu0 %v3655_v20  ;;  %v3659_v27 = vpack.c.bf16 %v101_v24, %v100_v23  ;;  %v84_v28 = vld [vmem:[%s5121_s29 + $0x40] sm:$0xff]  ;;  %v85_v29 = vld [vmem:[%s5121_s29 + $0x48] sm:$0xff]  ;;  %s5123_s1 = sld [smem:[#allocation7_spill]]  ;;  %vm217_vm0 = vcmask 261120  }
  0x1c   :  { %v102_v30 = vld [vmem:[%s5121_s29 + $0xd0] sm:$0xff]  ;;  %v103_v31 = vld [vmem:[%s5121_s29 + $0xd8] sm:$0xff]  ;;  %v3661_v32 = vpack.c.bf16 %v85_v29, %v84_v28  ;;  %v104_v36 = vld [vmem:[%s5121_s29 + $0xe0] sm:$0xff]  ;;  %vm221_vm1 = vcmask 254976   ;;  %s5124_s26 = sld [smem:[#allocation10_spill]]  ;;  %s5125_s30 = sld [smem:[#allocation8_spill]] }
  0x1d   :  { %v3663_v33 = vpack.c.bf16 %v103_v31, %v102_v30  ;;  %v86_v34 = vld [vmem:[%s5121_s29 + $0x50] sm:$0xff]  ;;  %v87_v35 = vld [vmem:[%s5121_s29 + $0x58] sm:$0xff]  ;;  %v105_v37 = vld [vmem:[%s5121_s29 + $0xe8] sm:$0xff]  ;;  %vm510_vm2 = vcmask 80896   ;;  %s5126_s2 = sld [smem:[#allocation9_spill]]  ;;  %s5127_s28 = sld [smem:[#allocation11_spill]] }
  0x1e   :  { %3658 = vmatpush3.bf16.msra.mxu0 %v3657_v26  ;;  %v3665_v38 = vpack.c.bf16 %v87_v35, %v86_v34  ;;  %v3667_v39 = vpack.c.bf16 %v105_v37, %v104_v36  ;;  %v88_v40 = vld [vmem:[%s5121_s29 + $0x60] sm:$0xff]  ;;  %v89_v41 = vld [vmem:[%s5121_s29 + $0x68] sm:$0xff]  ;;  %v106_v42 = vld [vmem:[%s5121_s29 + $0xf0] sm:$0xff]  ;;  %vm541_vm3 = vcmask 1041408   ;;  %vm4080_vm4 = vmmov 1   ;;  %s4084_s4 = smov [#allocation2]  }
  0x1f   :  { %3660 = vmatprep.subr.bf16.mxu0 %v3659_v27  ;;  %v107_v43 = vld [vmem:[%s5121_s29 + $0xf8] sm:$0xff]  ;;  %v3669_v44 = vpack.c.bf16 %v89_v41, %v88_v40  ;;  %v90_v46 = vld [vmem:[%s5121_s29 + $0x70] sm:$0xff]  ;;  %v72_v49 = vld [vmem:[%s5122_s25] sm:$0xff]  ;;  %vm798_vm6 = vcmask 523264   ;;  %vm914_vm8 = vcmask 648192   ;;  %vm910_vm9 = vcmask 654336  }
  0x20   :  { %v3671_v45 = vpack.c.bf16 %v107_v43, %v106_v42  ;;  %v91_v47 = vld [vmem:[%s5121_s29 + $0x78] sm:$0xff]  ;;  %v74_v51 = vld [vmem:[%s5122_s25 + $0x10] sm:$0x3]  ;;  %v424_v22 = vld [vmem:[%s5091_s7] sm:$0xff]  ;;  %vm4082_vm10 = vmmov 0   ;;  %vm2771_vm11 = vcmask 74752  }
  0x21   :  { %v3673_v48 = vpack.c.bf16 %v91_v47, %v90_v46  ;;  %v75_v50 = vld [vmem:[%s5122_s25 + $0x18] sm:$0x3]  ;;  %v108_v53 = vld [vmem:[%s5123_s1] sm:$0xff]  ;;  %v109_v58 = vld [vmem:[%s5123_s1 + $0x8] sm:$0x3] }
  0x22   :  { %3662 = vmatpush3.bf16.msra.mxu0 %v3661_v32  ;;  %v338_v10 = vld [vmem:[%s5124_s26] sm:$0xff]  ;;  %v339_v11 = vld [vmem:[%s5124_s26 + $0x8] sm:$0xff]  ;;  %v340_v16 = vld [vmem:[%s5124_s26 + $0x10] sm:$0xff] }
  0x23   :  { %3664 = vmatprep.subr.bf16.mxu0 %v3663_v33  ;;  %v3683_v12 = vpack.c.bf16 %v339_v11, %v338_v10  ;;  %v246_v13 = vld [vmem:[%s5125_s30] sm:$0xff]  ;;  %v247_v14 = vld [vmem:[%s5125_s30 + $0x8] sm:$0xff]  ;;  %v341_v17 = vld [vmem:[%s5124_s26 + $0x18] sm:$0xff] }
  0x24   :  { %v3675_v15 = vpack.c.bf16 %v247_v14, %v246_v13  ;;  %v3687_v18 = vpack.c.bf16 %v341_v17, %v340_v16  ;;  %v248_v19 = vld [vmem:[%s5125_s30 + $0x10] sm:$0xff]  ;;  %v249_v20 = vld [vmem:[%s5125_s30 + $0x18] sm:$0xff]  ;;  %v425_v23 = vld [vmem:[%s5091_s7 + $0x8] sm:$0xff] }
  0x25   :  { %3684 = vmatprep.subr.bf16.mxu1 %v3683_v12  ;;  %v3679_v21 = vpack.c.bf16 %v249_v20, %v248_v19  ;;  %v3691_v24 = vpack.c.bf16 %v425_v23, %v424_v22  ;;  %v426_v33 = vld [vmem:[%s5091_s7 + $0x10] sm:$0xff]  ;;  %v427_v34 = vld [vmem:[%s5091_s7 + $0x18] sm:$0xff]  ;;  %v2790_v40 = vld [vmem:[%s5127_s28] ss:$0 sm:$0xff] }
  0x26   :  { %3666 = vmatpush3.bf16.msra.mxu0 %v3665_v38  ;;  %3686 = vmatpush3.bf16.msra.mxu1 %v3683_v12  ;;  %v3695_v37 = vpack.c.bf16 %v427_v34, %v426_v33  ;;  %v4371_v38 = vld [vmem:[%s5102_s18] sm:$0xff]  ;;  %vm4385_vm5 = vmpackc.low %vm541_vm3, %vm4080_vm4  ;;  %v4497_v10 = vld [vmem:[%s5103_s19 + $0x18] sm:$0xff] }
  0x27   :  { %3668 = vmatprep.subr.bf16.mxu0 %v3667_v39  ;;  %3688 = vmatprep.subr.bf16.mxu1 %v3687_v18  ;;  %v2787_v39 = vld [vmem:[%s5126_s2] ss:$0 sm:$0xff]  ;;  %vm4501_vm7 = vmpackc.low %vm798_vm6, %vm798_vm6  ;;  %v4508_v12 = vld [vmem:[%s5103_s19 + $0x10] sm:$0xff] }
  0x28   :  { %v4524_v19 = vld [vmem:[%s5103_s19 + $0x20] sm:$0xff] }
  0x29   :  { %v4552_v33 = vld [vmem:[%s5103_s19 + $0x40] sm:$0xff] }
  0x2a   :  { %3670 = vmatpush3.bf16.msra.mxu0 %v3669_v44  ;;  %3690 = vmatpush3.bf16.msra.mxu1 %v3687_v18  ;;  %v4517_v18 = vld [vmem:[%s5103_s19 + $0x28] sm:$0xff] }
  0x2b   :  { %3672 = vmatprep.subr.bf16.mxu0 %v3671_v45  ;;  %3692 = vmatprep.subr.bf16.mxu1 %v3691_v24 }
  0x2e   :  { %3674 = vmatpush3.bf16.msra.mxu0 %v3673_v48 }
  0x2f   :  { %3676 = vmatprep.subr.bf16.mxu0 %v3675_v15 }
  0x31   :  { %175 = vmatmul.mubr.f32.vlgmr.msra.gmra.mrb[0].mxu0 %v72_v49 }
  0x32   :  { %179 = vmatprep.mubr.f32.mxu0 %v75_v50  ;;  %3678 = vmatpush3.bf16.msra.mxu0 %v3675_v15  ;;  %v2793_v50 = vld [vmem:[%s5092_s8] ss:$0 sm:$0xff] }
  0x33   :  { %3680 = vmatprep.subr.bf16.mxu0 %v3679_v21 }
  0x35   :  { %180 = vmatmul.mubr.f32.gmra.mrb[2].mxu0 %v74_v51  ;;  %v4399_v51 = vld [vmem:[%s5102_s18 + $0x8] sm:$0xff] }
  0x36   :  { %3682 = vmatpush3.bf16.msra.mxu0 %v3679_v21 }
 0x104   :  { %v2977_v52 = vpop.f32.mrb[0].mxu0 }
 0x105   :  { %v2978_v54 = vpop.f32.mrb[1].mxu0 }
 0x106   :  { %v2979_v55 = vadd.f32 %v2978_v54, %v2977_v52 }
 0x108   :  { %v4311_v56 = vadd.f32 %v2979_v55, %v108_v53  ;;  %v2980_v57 = vpop.f32.mrb[2].mxu0  ;;  %v4404_v53 = vld [vmem:[%s5102_s18 + $0x10] sm:$0xff] }
 0x109   :  { %v2981_v59 = vpop.f32.mrb[3].mxu0 }
 0x10a   :  { %v2982_v60 = vadd.f32 %v2981_v59, %v2980_v57  ;;  %v218_v61 = vsel %vm217_vm0, %v4311_v56, 0.0 }
 0x10b   :  { %219 = vadd.xlane.f32.xlu0 %v218_v61  ;;  %v4431_v61 = vld [vmem:[%s5102_s18 + $0x28] sm:$0xff] }
 0x10c   :  { %v4318_v62 = vadd.f32 %v2982_v60, %v109_v58  ;;  %v4413_v58 = vld [vmem:[%s5102_s18 + $0x18] sm:$0xff]  ;;  %v4418_v60 = vld [vmem:[%s5102_s18 + $0x20] sm:$0xff] }
 0x10e   :  { %v222_v63 = vsel %vm221_vm1, %v4318_v62, 0.0 }
 0x10f   :  { %223 = vadd.xlane.f32.xlu0 %v222_v63  ;;  %v4436_v63 = vld [vmem:[%s5102_s18 + $0x30] sm:$0xff] }
 0x198   :  { %v220_v0 = vpop.xlane.xlu0 %219 }
 0x199   :  { %v226_v1 = vmul.f32 0.03125, %v220_v0  ;;  %v4447_v0 = vld [vmem:[%s5102_s18 + $0x38] sm:$0xff] }
 0x19b   :  { %v228_v2 = vsub.f32 %v4311_v56, %v226_v1  ;;  %v4454_v1 = vld [vmem:[%s5102_s18 + $0x40] sm:$0xff] }
 0x19c   :  { %v224_v3 = vpop.xlane.xlu0 %223 }
 0x19d   :  { %v227_v4 = vmul.f32 0.03125, %v224_v3  ;;  %v230_v5 = vmul.f32 %v228_v2, %v228_v2 }
 0x19f   :  { %v229_v6 = vsub.f32 %v4318_v62, %v227_v4  ;;  %v232_v7 = vsel %vm217_vm0, %v230_v5, 0.0  ;;  %v4485_v4 = vld [vmem:[%s5103_s19 + $0x8] sm:$0xff]  ;;  %v4490_v5 = vld [vmem:[%s5103_s19] sm:$0xff] }
 0x1a0   :  { %233 = vadd.xlane.f32.xlu1 %v232_v7 }
 0x1a1   :  { %v231_v8 = vmul.f32 %v229_v6, %v229_v6 }
 0x1a3   :  { %v235_v9 = vsel %vm221_vm1, %v231_v8, 0.0 }
 0x1a4   :  { %236 = vadd.xlane.f32.xlu1 %v235_v9 }
 0x22d   :  { %v234_v25 = vpop.xlane.xlu1 %233 }
 0x22e   :  { %v238_v26 = vmul.f32 0.03125, %v234_v25  ;;  %v4533_v25 = vld [vmem:[%s5103_s19 + $0x38] sm:$0xff] }
 0x230   :  { %v240_v27 = vadd.f32 1e-05, %v238_v26  ;;  %v4538_v26 = vld [vmem:[%s5103_s19 + $0x30] sm:$0xff] }
 0x231   :  { %v237_v28 = vpop.xlane.xlu1 %236 }
 0x232   :  { %4014 = vrsqrt.f32 %v240_v27  ;;  %v239_v29 = vmul.f32 0.03125, %v237_v28 }
 0x234   :  { %v241_v30 = vadd.f32 1e-05, %v239_v29 }
 0x236   :  { %4016 = vrsqrt.f32 %v241_v30 }
 0x23c   :  { %v4015_v31 = vpop.eup %4014 }
 0x23d   :  { %v244_v32 = vmul.f32 %v4015_v31, %v228_v2  ;;  %v4465_v2 = vld [vmem:[%s5102_s18 + $0x48] sm:$0xff] }
 0x23f   :  { %3223 = vmatprep.mubr.msk.f32.mxu0 %vm217_vm0, %v244_v32  ;;  %3234 = vmatprep.mubr.msk.f32.mxu1 %vm217_vm0, %v244_v32 }
 0x240   :  { %v4017_v35 = vpop.eup %4016 }
 0x241   :  { %v245_v36 = vmul.f32 %v4017_v35, %v229_v6 }
 0x243   :  { %3224 = vmatmul.mubr.msk.f32.vlgmr.msra.gmra.mrb[4].mxu0 %vm217_vm0, %v245_v36  ;;  %3235 = vmatmul.mubr.msk.f32.vlgmr.msra.gmra.mrb[0].mxu1 %vm217_vm0, %v245_v36 }
 0x244   :  { %3694 = vmatpush3.bf16.msra.mxu1 %v3691_v24  ;;  %3245 = vmatprep.mubr.msk.f32.mxu1 %vm217_vm0, %v244_v32  ;;  %v4545_v32 = vld [vmem:[%s5103_s19 + $0x48] sm:$0xff] }
 0x245   :  { %3696 = vmatprep.subr.bf16.mxu1 %v3695_v37  ;;  %3271 = vmatprep.mubr.msk.f32.mxu0 %vm510_vm2, %v4371_v38 }
 0x248   :  { %3698 = vmatpush3.bf16.msra.mxu1 %v3695_v37 }
 0x24b   :  { %3246 = vmatmul.mubr.msk.f32.vlgmr.msra.gmra.mrb[2].mxu1 %vm217_vm0, %v245_v36 }
 0x24c   :  { %3252 = vmatprep.mubr.msk.f32.mxu1 %vm510_vm2, %v4371_v38 }
 0x316   :  { %v3225_v41 = vpop.f32.mrb[4].mxu0  ;;  %v3236_v42 = vpop.f32.mrb[0].mxu1 }
 0x317   :  { %v4383_v43 = vadd.f32 %v3225_v41, %v2787_v39  ;;  %v421_v44 = vadd.f32 %v3236_v42, %v2790_v40  ;;  %v329_v45 = vpop.f32.mrb[5].mxu0  ;;  %v415_v46 = vpop.f32.mrb[1].mxu1  ;;  %v207_v41 = vld [vmem:[%s5104_s20] sm:$0xff]  ;;  %v208_v42 = vld [vmem:[%s5104_s20 + $0x8] sm:$0xff] }
 0x318   :  { %v416_v47 = vadd.f32 %v2790_v40, %v415_v46  ;;  %v330_v3 = vadd.f32 %v2787_v39, %v329_v45  ;;  %v4583_v45 = vld [vmem:[%s5101_s17 + $0x8] sm:$0x3] }
 0x31a   :  { %v3699_v49 = vpack.c.bf16 %v421_v44, %v416_v47  ;;  %v4576_v44 = vpack.c.bf16 %v208_v42, %v207_v41 }
 0x31c   :  { %3701 = vmatprep.subr.msk.bf16.mxu1 %vm4385_vm5, %v3699_v49 }
 0x31d   :  { %3704 = vmatpush3.bf16.msk.msra.mxu1 %vm4385_vm5, %v3699_v49 }
 0x31e   :  { %v3247_v52 = vpop.f32.mrb[2].mxu1 }
 0x31f   :  { %v507_v54 = vadd.f32 %v3247_v52, %v2793_v50  ;;  %v501_v55 = vpop.f32.mrb[3].mxu1 }
 0x320   :  { %v502_v57 = vadd.f32 %v2793_v50, %v501_v55  ;;  %3253 = vmatmul.mubr.msk.f32.vlgmr.msra.gmra.mrb[4].mxu1 %vm510_vm2, %v4399_v51  ;;  %v209_v55 = vld [vmem:[%s5104_s20 + $0x10] sm:$0xff] }
 0x321   :  { %3255 = vmatprep.mubr.msk.f32.mxu1 %vm510_vm2, %v4404_v53 }
 0x322   :  { %v3705_v59 = vpack.c.bf16 %v507_v54, %v502_v57  ;;  %v210_v57 = vld [vmem:[%s5104_s20 + $0x18] sm:$0xff] }
 0x324   :  { %3707 = vmatprep.subr.msk.bf16.mxu0 %vm4385_vm5, %v3705_v59  ;;  %3256 = vmatmul.mubr.msk.f32.gmra.mrb[6].mxu1 %vm510_vm2, %v4413_v58 }
 0x325   :  { %3710 = vmatpush3.bf16.msk.msra.mxu0 %vm4385_vm5, %v3705_v59  ;;  %3258 = vmatprep.mubr.msk.f32.mxu1 %vm510_vm2, %v4418_v60  ;;  %v4600_v59 = vpack.c.bf16 %v210_v57, %v209_v55 }
 0x326   :  { %3742 = vmatprep.subr.bf16.mxu0 %v4576_v44 }
 0x328   :  { %3259 = vmatmul.mubr.msk.f32.gmra.mrb[8].mxu1 %vm510_vm2, %v4431_v61  ;;  %3272 = vmatmul.mubr.msk.f32.vlgmr.msra.gmra.mrb[6].mxu0 %vm510_vm2, %v4399_v51 }
 0x329   :  { %3261 = vmatprep.mubr.msk.f32.mxu1 %vm510_vm2, %v4436_v63  ;;  %3274 = vmatprep.mubr.msk.f32.mxu0 %vm510_vm2, %v4404_v53 }
 0x32a   :  { %3744 = vmatpush3.bf16.msra.mxu0 %v4576_v44 }
 0x32b   :  { %3746 = vmatprep.subr.bf16.mxu0 %v4600_v59 }
 0x32c   :  { %3262 = vmatmul.mubr.msk.f32.gmra.mrb[10].mxu1 %vm510_vm2, %v4447_v0  ;;  %3275 = vmatmul.mubr.msk.f32.gmra.mrb[8].mxu0 %vm510_vm2, %v4413_v58 }
 0x32d   :  { %3264 = vmatprep.mubr.msk.f32.mxu1 %vm510_vm2, %v4454_v1  ;;  %3277 = vmatprep.mubr.msk.f32.mxu0 %vm510_vm2, %v4418_v60 }
 0x32e   :  { %3748 = vmatpush3.bf16.msra.mxu0 %v4600_v59 }
 0x330   :  { %3265 = vmatmul.mubr.msk.f32.gmra.mrb[12].mxu1 %vm510_vm2, %v4465_v2  ;;  %3278 = vmatmul.mubr.msk.f32.gmra.mrb[10].mxu0 %vm510_vm2, %v4431_v61 }
 0x331   :  { %3306 = vmatprep.mubr.msk.f32.mxu1 %vm798_vm6, %v330_v3  ;;  %3280 = vmatprep.mubr.msk.f32.mxu0 %vm510_vm2, %v4436_v63  ;;  %v211_v3 = vld [vmem:[%s5104_s20 + $0x20] sm:$0xff] }
 0x334   :  { %3281 = vmatmul.mubr.msk.f32.gmra.mrb[12].mxu0 %vm510_vm2, %v4447_v0 }
 0x335   :  { %3283 = vmatprep.mubr.msk.f32.mxu0 %vm510_vm2, %v4454_v1 }
 0x338   :  { %3284 = vmatmul.mubr.msk.f32.gmra.mrb[14].mxu0 %vm510_vm2, %v4465_v2 }
 0x3f3   :  { %v3254_v6 = vpop.f32.mrb[4].mxu1 }
 0x3f4   :  { %v661_v7 = vmul.f32 %v3254_v6, %v4485_v4  ;;  %v611_v8 = vpop.f32.mrb[5].mxu1  ;;  %v212_v6 = vld [vmem:[%s5104_s20 + $0x28] sm:$0xff] }
 0x3f5   :  { %v660_v9 = vmul.f32 %v611_v8, %v4490_v5  ;;  %v213_v8 = vld [vmem:[%s5104_s20 + $0x30] sm:$0xff] }
 0x3f7   :  { %v3711_v13 = vpack.c.bf16 %v661_v7, %v660_v9  ;;  %v3257_v14 = vpop.f32.mrb[6].mxu1  ;;  %v4610_v7 = vpack.c.bf16 %v212_v6, %v211_v3  ;;  %v214_v9 = vld [vmem:[%s5104_s20 + $0x38] sm:$0xff] }
 0x3f8   :  { %v663_v15 = vmul.f32 %v3257_v14, %v4497_v10  ;;  %v621_v16 = vpop.f32.mrb[7].mxu1  ;;  %v4622_v14 = vpack.c.bf16 %v214_v9, %v213_v8 }
 0x3f9   :  { %3713 = vmatprep.subr.msk.bf16.mxu1 %vm4501_vm7, %v3711_v13  ;;  %v662_v17 = vmul.f32 %v621_v16, %v4508_v12  ;;  %3750 = vmatprep.subr.bf16.mxu0 %v4610_v7 }
 0x3fa   :  { %3716 = vmatpush3.bf16.xpose.msk.msra.mxu1 %vm4501_vm7, %v3711_v13  ;;  %v215_v13 = vld [vmem:[%s5104_s20 + $0x40] sm:$0xff]  ;;  %3752 = vmatpush3.bf16.msra.mxu0 %v4610_v7 }
 0x3fb   :  { %v3717_v20 = vpack.c.bf16 %v663_v15, %v662_v17  ;;  %v3260_v21 = vpop.f32.mrb[8].mxu1  ;;  %v216_v15 = vld [vmem:[%s5104_s20 + $0x48] sm:$0xff]  ;;  %3754 = vmatprep.subr.bf16.mxu0 %v4622_v14  ;;  %v3273_v17 = vpop.f32.mrb[6].mxu0 }
 0x3fc   :  { %v665_v22 = vmul.f32 %v3260_v21, %v4517_v18  ;;  %v631_v23 = vpop.f32.mrb[9].mxu1  ;;  %v4629_v16 = vpack.c.bf16 %v216_v15, %v215_v13  ;;  %v739_v21 = vpop.f32.mrb[7].mxu0 }
 0x3fd   :  { %3719 = vmatprep.subr.msk.bf16.mxu1 %vm4501_vm7, %v3717_v20  ;;  %v664_v24 = vmul.f32 %v631_v23, %v4524_v19 }
 0x3fe   :  { %3756 = vmatpush3.bf16.msra.mxu0 %v4622_v14 }
 0x3ff   :  { %v3723_v27 = vpack.c.bf16 %v665_v22, %v664_v24  ;;  %v3263_v28 = vpop.f32.mrb[10].mxu1  ;;  %3758 = vmatprep.subr.bf16.mxu0 %v4629_v16  ;;  %v788_v22 = vmul.f32 %v739_v21, %v4490_v5  ;;  %v3276_v23 = vpop.f32.mrb[8].mxu0  ;;  %v1092_v21 = vld [vmem:[%s5093_s9 + $0x10] sm:$0xff] }
 0x400   :  { %v667_v29 = vmul.f32 %v3263_v28, %v4533_v25  ;;  %v641_v30 = vpop.f32.mrb[11].mxu1  ;;  %v791_v24 = vmul.f32 %v3276_v23, %v4497_v10  ;;  %v1093_v23 = vld [vmem:[%s5093_s9 + $0x18] sm:$0xff] }
 0x401   :  { %v666_v31 = vmul.f32 %v641_v30, %v4538_v26 }
 0x402   :  { %3722 = vmatpush3.bf16.xpose.msk.msra.mxu1 %vm4501_vm7, %v3717_v20  ;;  %3760 = vmatpush3.bf16.msra.mxu0 %v4629_v16  ;;  %v789_v20 = vmul.f32 %v3273_v17, %v4485_v4 }
 0x403   :  { %3725 = vmatprep.subr.msk.bf16.mxu1 %vm4501_vm7, %v3723_v27  ;;  %v3729_v34 = vpack.c.bf16 %v667_v29, %v666_v31  ;;  %v3266_v35 = vpop.f32.mrb[12].mxu1 }
 0x404   :  { %v669_v36 = vmul.f32 %v3266_v35, %v4545_v32  ;;  %v651_v37 = vpop.f32.mrb[13].mxu1  ;;  %v3761_v28 = vpack.c.bf16 %v789_v20, %v788_v22 }
 0x405   :  { %v668_v39 = vmul.f32 %v651_v37, %v4552_v33 }
 0x406   :  { %3762 = vmatprep.subr.bf16.mxu0 %v3761_v28 }
 0x407   :  { %v3735_v40 = vpack.c.bf16 %v669_v36, %v668_v39 }
 0x40a   :  { %3728 = vmatpush3.bf16.xpose.msk.msra.mxu1 %vm4501_vm7, %v3723_v27  ;;  %v749_v27 = vpop.f32.mrb[9].mxu0 }
 0x40b   :  { %3731 = vmatprep.subr.msk.bf16.mxu1 %vm4501_vm7, %v3729_v34  ;;  %v790_v29 = vmul.f32 %v749_v27, %v4508_v12  ;;  %v3279_v30 = vpop.f32.mrb[10].mxu0  ;;  %v1094_v27 = vld [vmem:[%s5093_s9 + $0x20] sm:$0xff] }
 0x40c   :  { %v793_v31 = vmul.f32 %v3279_v30, %v4517_v18  ;;  %v1096_v30 = vld [vmem:[%s5093_s9 + $0x30] sm:$0xff] }
 0x40d   :  { %v3765_v35 = vpack.c.bf16 %v791_v24, %v790_v29  ;;  %v3785_v24 = vpack.c.bf16 %v1093_v23, %v1092_v21  ;;  %v1216_v23 = vld [vmem:[%s5095_s11] sm:$0xff] }
 0x412   :  { %3734 = vmatpush3.bf16.xpose.msk.msra.mxu1 %vm4501_vm7, %v3729_v34  ;;  %v759_v34 = vpop.f32.mrb[11].mxu0 }
 0x413   :  { %3737 = vmatprep.subr.msk.bf16.mxu1 %vm4501_vm7, %v3735_v40  ;;  %v792_v36 = vmul.f32 %v759_v34, %v4524_v19  ;;  %v3282_v37 = vpop.f32.mrb[12].mxu0 }
 0x414   :  { %v795_v39 = vmul.f32 %v3282_v37, %v4533_v25 }
 0x415   :  { %v3769_v41 = vpack.c.bf16 %v793_v31, %v792_v36  ;;  %v1097_v31 = vld [vmem:[%s5093_s9 + $0x38] sm:$0xff] }
 0x416   :  { %v3793_v34 = vpack.c.bf16 %v1097_v31, %v1096_v30  ;;  %v1318_v31 = vld [vmem:[%s5097_s13] sm:$0xff] }
 0x41a   :  { %3740 = vmatpush3.bf16.xpose.msk.msra.mxu1 %vm4501_vm7, %v3735_v40  ;;  %v769_v40 = vpop.f32.mrb[13].mxu0 }
 0x41b   :  { %v794_v42 = vmul.f32 %v769_v40, %v4538_v26 }
 0x421   :  { %3307 = vmatmul.mubr.msk.f32.vlgmr.msra.gmra.mrb[14].mxu1 %vm798_vm6, %v4383_v43  ;;  %v4588_v43 = vld [vmem:[%s5101_s17] sm:$0xff] }
 0x4f4   :  { %v3308_v46 = vpop.f32.mrb[14].mxu1 }
 0x4f5   :  { %v907_v47 = vadd.f32 %v3308_v46, %v4583_v45  ;;  %v901_v49 = vpop.f32.mrb[15].mxu1  ;;  %v3285_v46 = vpop.f32.mrb[14].mxu0 }
 0x4f6   :  { %v902_v50 = vadd.f32 %v901_v49, %v4588_v43  ;;  %v3773_v49 = vpack.c.bf16 %v795_v39, %v794_v42 }
 0x4f7   :  { %v915_v52 = vsel %vm914_vm8, %v907_v47, -inf }
 0x4f8   :  { %916 = vmax.xlane.f32.xlu1 %v915_v52  ;;  %v911_v54 = vsel %vm910_vm9, %v902_v50, -inf  ;;  %v797_v52 = vmul.f32 %v3285_v46, %v4545_v32 }
 0x4f9   :  { %912 = vmax.xlane.f32.xlu0 %v911_v54  ;;  %v779_v54 = vpop.f32.mrb[15].mxu0 }
 0x4fa   :  { %v796_v55 = vmul.f32 %v779_v54, %v4552_v33 }
 0x4fc   :  { %v3777_v57 = vpack.c.bf16 %v797_v52, %v796_v55  ;;  %v2836_v52 = vld [vmem:[%s5094_s10] ss:$0 sm:$0xff] }
 0x585   :  { %v917_v3 = vpop.xlane.xlu1 %916 }
 0x586   :  { %v919_v6 = vsub.f32 %v907_v47, %v917_v3  ;;  %v913_v8 = vpop.xlane.xlu0 %912  ;;  %v1090_v47 = vld [vmem:[%s5093_s9] sm:$0xff] }
 0x587   :  { %v918_v9 = vsub.f32 %v902_v50, %v913_v8  ;;  %v1091_v50 = vld [vmem:[%s5093_s9 + $0x8] sm:$0xff] }
 0x588   :  { %v922_v13 = vmul.f32 1.442695, %v919_v6  ;;  %v3781_v22 = vpack.c.bf16 %v1091_v50, %v1090_v47 }
 0x589   :  { %v920_v15 = vmul.f32 1.442695, %v918_v9 }
 0x58a   :  { %3782 = vmatprep.subr.bf16.mxu1 %v3781_v22 }
 0x58b   :  { %4018 = vpow2.f32 %v920_v15  ;;  %3784 = vmatpush3.bf16.msra.mxu1 %v3781_v22 }
 0x58c   :  { %4020 = vpow2.f32 %v922_v13  ;;  %3786 = vmatprep.subr.bf16.mxu1 %v3785_v24 }
 0x58f   :  { %3788 = vmatpush3.bf16.msra.mxu1 %v3785_v24  ;;  %v1217_v24 = vld [vmem:[%s5095_s11 + $0x8] sm:$0xff] }
 0x595   :  { %v4019_v17 = vpop.eup %4018 }
 0x596   :  { %v4021_v20 = vpop.eup %4020  ;;  %3329 = vmatprep.mubr.msk.f32.mxu0 %vm910_vm9, %v4019_v17 }
 0x597   :  { %3330 = vmatmul.mubr.msk.f32.vlgmr.msra.gmra.mrb[16].mxu0 %vm910_vm9, %v4021_v20 }
 0x598   :  { %3764 = vmatpush3.bf16.msra.mxu0 %v3761_v28  ;;  %v1095_v28 = vld [vmem:[%s5093_s9 + $0x28] sm:$0xff] }
 0x599   :  { %3766 = vmatprep.subr.bf16.mxu0 %v3765_v35  ;;  %v3789_v29 = vpack.c.bf16 %v1095_v28, %v1094_v27  ;;  %v1218_v27 = vld [vmem:[%s5095_s11 + $0x10] sm:$0xff]  ;;  %v3797_v28 = vpack.c.bf16 %v1217_v24, %v1216_v23  ;;  %v1330_v24 = vld [vmem:[%s5097_s13 + $0x60] sm:$0xff] }
 0x59b   :  { %3790 = vmatprep.subr.bf16.mxu1 %v3789_v29 }
 0x59c   :  { %3768 = vmatpush3.bf16.msra.mxu0 %v3765_v35  ;;  %3792 = vmatpush3.bf16.msra.mxu1 %v3789_v29  ;;  %v1219_v29 = vld [vmem:[%s5095_s11 + $0x18] sm:$0xff] }
 0x59d   :  { %3770 = vmatprep.subr.bf16.mxu0 %v3769_v41  ;;  %3794 = vmatprep.subr.bf16.mxu1 %v3793_v34  ;;  %v3801_v30 = vpack.c.bf16 %v1219_v29, %v1218_v27  ;;  %v1331_v27 = vld [vmem:[%s5097_s13 + $0x68] sm:$0xff]  ;;  %v1332_v29 = vld [vmem:[%s5097_s13 + $0x70] sm:$0xff] }
 0x5a0   :  { %3772 = vmatpush3.bf16.msra.mxu0 %v3769_v41  ;;  %3796 = vmatpush3.bf16.msra.mxu1 %v3793_v34  ;;  %v1319_v34 = vld [vmem:[%s5097_s13 + $0x8] sm:$0xff] }
 0x5a1   :  { %3774 = vmatprep.subr.bf16.mxu0 %v3773_v49 }
 0x5a4   :  { %3776 = vmatpush3.bf16.msra.mxu0 %v3773_v49 }
 0x5a5   :  { %3778 = vmatprep.subr.bf16.mxu0 %v3777_v57 }
 0x5a8   :  { %3780 = vmatpush3.bf16.msra.mxu0 %v3777_v57 }
 0x5a9   :  { %3798 = vmatprep.subr.bf16.mxu0 %v3797_v28 }
 0x66a   :  { %v3331_v35 = vpop.f32.mrb[16].mxu0 }
 0x66b   :  { %4022 = vrcp.f32 %v3331_v35  ;;  %v996_v36 = vpop.f32.mrb[17].mxu0  ;;  %v1320_v35 = vld [vmem:[%s5097_s13 + $0x10] sm:$0xff] }
 0x66c   :  { %4024 = vrcp.f32 %v996_v36  ;;  %v3805_v36 = vpack.c.bf16 %v1319_v34, %v1318_v31  ;;  %v2837_v34 = vld [vmem:[%s5096_s12] ss:$0 sm:$0xff] }
 0x66e   :  { %3806 = vmatprep.subr.bf16.mxu1 %v3805_v36 }
 0x675   :  { %v4023_v37 = vpop.eup %4022 }
 0x676   :  { %v4025_v39 = vpop.eup %4024  ;;  %v1008_v41 = vmul.f32 %v4023_v37, %v4021_v20  ;;  %v1321_v37 = vld [vmem:[%s5097_s13 + $0x18] sm:$0xff] }
 0x677   :  { %v1006_v40 = vmul.f32 %v4025_v39, %v4019_v17  ;;  %v3809_v39 = vpack.c.bf16 %v1321_v37, %v1320_v35 }
 0x679   :  { %3352 = vmatprep.mubr.msk.f32.mxu0 %vm910_vm9, %v1006_v40  ;;  %v1322_v40 = vld [vmem:[%s5097_s13 + $0x20] sm:$0xff] }
 0x67a   :  { %3353 = vmatmul.mubr.msk.f32.vlgmr.msra.gmra.mrb[18].mxu0 %vm910_vm9, %v1008_v41  ;;  %v1323_v41 = vld [vmem:[%s5097_s13 + $0x28] sm:$0xff] }
 0x67b   :  { %3800 = vmatpush3.bf16.msra.mxu0 %v3797_v28  ;;  %v3829_v28 = vpack.c.bf16 %v1331_v27, %v1330_v24 }
 0x67c   :  { %3802 = vmatprep.subr.bf16.mxu0 %v3801_v30 }
 0x67f   :  { %3804 = vmatpush3.bf16.msra.mxu0 %v3801_v30  ;;  %v1333_v30 = vld [vmem:[%s5097_s13 + $0x78] sm:$0xff] }
 0x680   :  { %v3833_v31 = vpack.c.bf16 %v1333_v30, %v1332_v29 }
 0x74d   :  { %v3354_v42 = vpop.f32.mrb[18].mxu0 }
 0x74e   :  { %v1081_v46 = vpop.f32.mrb[19].mxu0 }
 0x74f   :  { %3371 = vmatprep.mubr.msk.f32.mxu1 %vm798_vm6, %v1081_v46 }
 0x750   :  { %3372 = vmatmul.mubr.msk.f32.vlgmr.msra.gmra.mrb[16].mxu1 %vm798_vm6, %v3354_v42  ;;  %v3813_v42 = vpack.c.bf16 %v1323_v41, %v1322_v40 }
 0x751   :  { %3808 = vmatpush3.bf16.msra.mxu1 %v3805_v36 }
 0x752   :  { %3810 = vmatprep.subr.bf16.mxu1 %v3809_v39 }
 0x755   :  { %3812 = vmatpush3.bf16.msra.mxu1 %v3809_v39 }
 0x756   :  { %3814 = vmatprep.subr.bf16.mxu1 %v3813_v42 }
 0x759   :  { %3816 = vmatpush3.bf16.msra.mxu1 %v3813_v42 }
 0x823   :  { %v3373_v49 = vpop.f32.mrb[16].mxu1 }
 0x824   :  { %v1180_v54 = vadd.f32 %v3373_v49, %v4318_v62  ;;  %v1170_v55 = vpop.f32.mrb[17].mxu1 }
 0x825   :  { %v1179_v57 = vadd.f32 %v1170_v55, %v4311_v56 }
 0x826   :  { %v4679_v3 = vadd.f32 %v2836_v52, %v1180_v54 }
 0x827   :  { %v4681_v6 = vadd.f32 %v2836_v52, %v1179_v57 }
 0x828   :  { %v1193_v8 = vsel %vm221_vm1, %v4679_v3, 0.0 }
 0x829   :  { %1194 = vadd.xlane.f32.xlu1 %v1193_v8  ;;  %v1190_v9 = vsel %vm217_vm0, %v4681_v6, 0.0 }
 0x82a   :  { %1191 = vadd.xlane.f32.xlu0 %v1190_v9 }
 0x8b6   :  { %v1195_v13 = vpop.xlane.xlu1 %1194 }
 0x8b7   :  { %v1197_v15 = vmul.f32 0.03125, %v1195_v13  ;;  %v1192_v17 = vpop.xlane.xlu0 %1191 }
 0x8b8   :  { %v1196_v20 = vmul.f32 0.03125, %v1192_v17  ;;  %v1324_v17 = vld [vmem:[%s5097_s13 + $0x30] sm:$0xff] }
 0x8b9   :  { %v1199_v62 = vsub.f32 %v4679_v3, %v1197_v15 }
 0x8ba   :  { %v1198_v56 = vsub.f32 %v4681_v6, %v1196_v20  ;;  %v1325_v20 = vld [vmem:[%s5097_s13 + $0x38] sm:$0xff] }
 0x8bb   :  { %v1201_v47 = vmul.f32 %v1199_v62, %v1199_v62 }
 0x8bc   :  { %v1200_v50 = vmul.f32 %v1198_v56, %v1198_v56 }
 0x8bd   :  { %v1205_v21 = vsel %vm221_vm1, %v1201_v47, 0.0  ;;  %v3817_v47 = vpack.c.bf16 %v1325_v20, %v1324_v17 }
 0x8be   :  { %1206 = vadd.xlane.f32.xlu1 %v1205_v21  ;;  %v1202_v22 = vsel %vm217_vm0, %v1200_v50, 0.0  ;;  %v1328_v21 = vld [vmem:[%s5097_s13 + $0x50] sm:$0xff] }
 0x8bf   :  { %1203 = vadd.xlane.f32.xlu0 %v1202_v22  ;;  %3818 = vmatprep.subr.bf16.mxu1 %v3817_v47  ;;  %v1329_v22 = vld [vmem:[%s5097_s13 + $0x58] sm:$0xff] }
 0x8c0   :  { %3820 = vmatpush3.bf16.msra.mxu1 %v3817_v47  ;;  %v3825_v23 = vpack.c.bf16 %v1329_v22, %v1328_v21 }
 0x94b   :  { %v1207_v46 = vpop.xlane.xlu1 %1206 }
 0x94c   :  { %v1209_v49 = vmul.f32 0.03125, %v1207_v46  ;;  %v1204_v52 = vpop.xlane.xlu0 %1203 }
 0x94d   :  { %v1208_v54 = vmul.f32 0.03125, %v1204_v52 }
 0x94e   :  { %v1211_v55 = vadd.f32 1e-05, %v1209_v49 }
 0x94f   :  { %v1210_v57 = vadd.f32 1e-05, %v1208_v54 }
 0x950   :  { %4026 = vrsqrt.f32 %v1211_v55 }
 0x951   :  { %4028 = vrsqrt.f32 %v1210_v57 }
 0x95a   :  { %v4027_v8 = vpop.eup %4026 }
 0x95b   :  { %v4029_v9 = vpop.eup %4028  ;;  %v1215_v15 = vmul.f32 %v4027_v8, %v1199_v62  ;;  %v1327_v62 = vld [vmem:[%s5097_s13 + $0x48] sm:$0xff] }
 0x95c   :  { %v1214_v13 = vmul.f32 %v4029_v9, %v1198_v56  ;;  %v1326_v56 = vld [vmem:[%s5097_s13 + $0x40] sm:$0xff] }
 0x95d   :  { %v3821_v50 = vpack.c.bf16 %v1327_v62, %v1326_v56 }
 0x95e   :  { %3382 = vmatprep.mubr.msk.f32.mxu0 %vm217_vm0, %v1214_v13  ;;  %v2840_v13 = vld [vmem:[%s5098_s14] ss:$0 sm:$0xff] }
 0x95f   :  { %3383 = vmatmul.mubr.msk.f32.vlgmr.msra.gmra.mrb[20].mxu0 %vm217_vm0, %v1215_v15  ;;  %3822 = vmatprep.subr.bf16.mxu1 %v3821_v50 }
 0x960   :  { %3824 = vmatpush3.bf16.msra.mxu1 %v3821_v50 }
 0x961   :  { %3826 = vmatprep.subr.bf16.mxu1 %v3825_v23 }
 0x964   :  { %3828 = vmatpush3.bf16.msra.mxu1 %v3825_v23 }
 0x965   :  { %3830 = vmatprep.subr.bf16.mxu1 %v3829_v28 }
 0x968   :  { %3832 = vmatpush3.bf16.msra.mxu1 %v3829_v28 }
 0x969   :  { %3834 = vmatprep.subr.bf16.mxu1 %v3833_v31 }
 0x96c   :  { %3836 = vmatpush3.bf16.msra.mxu1 %v3833_v31  ;;  %v2841_v31 = vld [vmem:[%s5125_s30 + $0x20] sm:$0xff] }
 0xa32   :  { %v3384_v35 = vpop.f32.mrb[20].mxu0 }
 0xa33   :  { %v1305_v36 = vadd.f32 %v3384_v35, %v2837_v34  ;;  %v1299_v37 = vpop.f32.mrb[21].mxu0  ;;  %v2843_v35 = vld [vmem:[%s5125_s30 + $0x30] sm:$0xff] }
 0xa34   :  { %v1300_v39 = vadd.f32 %v2837_v34, %v1299_v37  ;;  %v2842_v34 = vld [vmem:[%s5125_s30 + $0x28] sm:$0xff]  ;;  %v2844_v37 = vld [vmem:[%s5125_s30 + $0x38] sm:$0xff] }
 0xa35   :  { %v1311_v40 = vmul.f32 0.70710677, %v1305_v36  ;;  %v1309_v55 = vmul.f32 0.5, %v1305_v36  ;;  %v3837_v36 = vpack.c.bf16 %v2842_v34, %v2841_v31 }
 0xa36   :  { %v1310_v41 = vmul.f32 0.70710677, %v1300_v39  ;;  %v1308_v52 = vmul.f32 0.5, %v1300_v39  ;;  %v3841_v39 = vpack.c.bf16 %v2844_v37, %v2843_v35 }
 0xa37   :  { %4030 = verf.f32 %v1311_v40  ;;  %3838 = vmatprep.subr.bf16.mxu0 %v3837_v36  ;;  %v2849_v40 = vld [vmem:[%s5124_s26 + $0x20] sm:$0xff] }
 0xa38   :  { %4032 = verf.f32 %v1310_v41  ;;  %3840 = vmatpush3.bf16.msra.mxu0 %v3837_v36  ;;  %v2850_v41 = vld [vmem:[%s5124_s26 + $0x28] sm:$0xff] }
 0xa39   :  { %3842 = vmatprep.subr.bf16.mxu0 %v3841_v39 }
 0xa3c   :  { %3844 = vmatpush3.bf16.msra.mxu0 %v3841_v39 }
 0xa41   :  { %v4031_v42 = vpop.eup %4030 }
 0xa42   :  { %v4033_v46 = vpop.eup %4032  ;;  %v1315_v49 = vadd.f32 1.0, %v4031_v42  ;;  %v3845_v42 = vpack.c.bf16 %v2850_v41, %v2849_v40 }
 0xa43   :  { %v1314_v54 = vadd.f32 1.0, %v4033_v46 }
 0xa44   :  { %v1317_v8 = vmul.f32 %v1315_v49, %v1309_v55  ;;  %3846 = vmatprep.subr.bf16.mxu0 %v3845_v42 }
 0xa45   :  { %v1316_v57 = vmul.f32 %v1314_v54, %v1308_v52 }
 0xa47   :  { %3417 = vmatprep.mubr.f32.mxu1 %v1316_v57 }
 0xa48   :  { %3418 = vmatmul.mubr.f32.vlgmr.msra.gmra.mrb[18].mxu1 %v1317_v8 }
 0xa49   :  { %3476 = vmatprep.mubr.msk.f32.mxu1 %vm510_vm2, %v4371_v38 }
 0xb1b   :  { %v3419_v9 = vpop.f32.mrb[18].mxu1 }
 0xb1c   :  { %v1410_v15 = vadd.f32 %v3419_v9, %v4679_v3  ;;  %v1400_v17 = vpop.f32.mrb[19].mxu1  ;;  %v2851_v9 = vld [vmem:[%s5124_s26 + $0x30] sm:$0xff] }
 0xb1d   :  { %v1409_v20 = vadd.f32 %v1400_v17, %v4681_v6 }
 0xb1e   :  { %v4763_v47 = vadd.f32 %v2840_v13, %v1410_v15 }
 0xb1f   :  { %v4765_v56 = vadd.f32 %v2840_v13, %v1409_v20  ;;  %v2852_v13 = vld [vmem:[%s5124_s26 + $0x38] sm:$0xff] }
 0xb20   :  { %v1423_v62 = vsel %vm221_vm1, %v4763_v47, 0.0 }
 0xb21   :  { %1424 = vadd.xlane.f32.xlu1 %v1423_v62  ;;  %v1420_v50 = vsel %vm217_vm0, %v4765_v56, 0.0  ;;  %v3849_v62 = vpack.c.bf16 %v2852_v13, %v2851_v9 }
 0xb22   :  { %1421 = vadd.xlane.f32.xlu0 %v1420_v50  ;;  %v2857_v50 = vld [vmem:[%s5091_s7 + $0x20] sm:$0xff] }
 0xbae   :  { %v1425_v21 = vpop.xlane.xlu1 %1424 }
 0xbaf   :  { %v1427_v22 = vmul.f32 0.03125, %v1425_v21  ;;  %v1422_v23 = vpop.xlane.xlu0 %1421  ;;  %v2858_v21 = vld [vmem:[%s5091_s7 + $0x28] sm:$0xff] }
 0xbb0   :  { %v1426_v24 = vmul.f32 0.03125, %v1422_v23  ;;  %v2859_v23 = vld [vmem:[%s5091_s7 + $0x30] sm:$0xff] }
 0xbb1   :  { %v1429_v3 = vsub.f32 %v4763_v47, %v1427_v22  ;;  %v3853_v22 = vpack.c.bf16 %v2858_v21, %v2857_v50 }
 0xbb2   :  { %v1428_v6 = vsub.f32 %v4765_v56, %v1426_v24  ;;  %v2860_v24 = vld [vmem:[%s5091_s7 + $0x38] sm:$0xff] }
 0xbb3   :  { %v1431_v27 = vmul.f32 %v1429_v3, %v1429_v3 }
 0xbb4   :  { %v1430_v28 = vmul.f32 %v1428_v6, %v1428_v6 }
 0xbb5   :  { %v1435_v29 = vsel %vm221_vm1, %v1431_v27, 0.0 }
 0xbb6   :  { %1436 = vadd.xlane.f32.xlu1 %v1435_v29  ;;  %v1432_v30 = vsel %vm217_vm0, %v1430_v28, 0.0 }
 0xbb7   :  { %1433 = vadd.xlane.f32.xlu0 %v1432_v30  ;;  %v2854_v30 = vld [vmem:[%s5127_s28 + $0x1] ss:$0 sm:$0xff] }
 0xc43   :  { %v1437_v46 = vpop.xlane.xlu1 %1436 }
 0xc44   :  { %v1439_v49 = vmul.f32 0.03125, %v1437_v46  ;;  %v1434_v52 = vpop.xlane.xlu0 %1433 }
 0xc45   :  { %v1438_v54 = vmul.f32 0.03125, %v1434_v52 }
 0xc46   :  { %v1441_v55 = vadd.f32 1e-05, %v1439_v49 }
 0xc47   :  { %v1440_v57 = vadd.f32 1e-05, %v1438_v54 }
 0xc48   :  { %4034 = vrsqrt.f32 %v1441_v55 }
 0xc49   :  { %4036 = vrsqrt.f32 %v1440_v57 }
 0xc52   :  { %v4035_v8 = vpop.eup %4034 }
 0xc53   :  { %v4037_v15 = vpop.eup %4036  ;;  %v1445_v20 = vmul.f32 %v4035_v8, %v1429_v3  ;;  %v3857_v3 = vpack.c.bf16 %v2860_v24, %v2859_v23 }
 0xc54   :  { %v1444_v17 = vmul.f32 %v4037_v15, %v1428_v6  ;;  %v2846_v6 = vld [vmem:[%s5126_s2 + $0x1] ss:$0 sm:$0xff] }
 0xc56   :  { %3428 = vmatprep.mubr.msk.f32.mxu0 %vm217_vm0, %v1444_v17 }
 0xc57   :  { %3429 = vmatmul.mubr.msk.f32.vlgmr.msra.gmra.mrb[22].mxu0 %vm217_vm0, %v1445_v20 }
 0xc58   :  { %3848 = vmatpush3.bf16.msra.mxu0 %v3845_v42  ;;  %3439 = vmatprep.mubr.msk.f32.mxu0 %vm217_vm0, %v1444_v17 }
 0xc59   :  { %3850 = vmatprep.subr.bf16.mxu0 %v3849_v62 }
 0xc5c   :  { %3852 = vmatpush3.bf16.msra.mxu0 %v3849_v62 }
 0xc5d   :  { %3854 = vmatprep.subr.bf16.mxu0 %v3853_v22 }
 0xc5f   :  { %3440 = vmatmul.mubr.msk.f32.vlgmr.msra.gmra.mrb[24].mxu0 %vm217_vm0, %v1445_v20 }
 0xc60   :  { %3856 = vmatpush3.bf16.msra.mxu0 %v3853_v22  ;;  %3450 = vmatprep.mubr.msk.f32.mxu0 %vm217_vm0, %v1444_v17 }
 0xc61   :  { %3858 = vmatprep.subr.bf16.mxu0 %v3857_v3 }
 0xc64   :  { %3860 = vmatpush3.bf16.msra.mxu0 %v3857_v3 }
 0xc67   :  { %3451 = vmatmul.mubr.msk.f32.vlgmr.msra.gmra.mrb[26].mxu0 %vm217_vm0, %v1445_v20 }
 0xc68   :  { %3457 = vmatprep.mubr.msk.f32.mxu0 %vm510_vm2, %v4371_v38  ;;  %v2862_v38 = vld [vmem:[%s5092_s8 + $0x1] ss:$0 sm:$0xff]  ;;  %s2779_s8 = sshll.u32 %s4084_s4, 4  ;;  %s2780_s8 = int_to_ptr.vmem [resolvable:$true] %s2779_s8 }
 0xc69   :  { %p4061_p1 = scmp.lt.s32.totalorder %s2780_s8, %s2780_s8 }
 0xd2a   :  { %v3430_v27 = vpop.f32.mrb[22].mxu0 }
 0xd2b   :  { %v4822_v28 = vadd.f32 %v3430_v27, %v2846_v6  ;;  %v1531_v29 = vpop.f32.mrb[23].mxu0 }
 0xd32   :  { %v3441_v31 = vpop.f32.mrb[24].mxu0 }
 0xd33   :  { %v1625_v34 = vadd.f32 %v3441_v31, %v2854_v30  ;;  %v1619_v35 = vpop.f32.mrb[25].mxu0 }
 0xd34   :  { %v1620_v36 = vadd.f32 %v2854_v30, %v1619_v35 }
 0xd36   :  { %v3861_v37 = vpack.c.bf16 %v1625_v34, %v1620_v36 }
 0xd38   :  { %3863 = vmatprep.subr.msk.bf16.mxu0 %vm4385_vm5, %v3861_v37 }
 0xd39   :  { %3866 = vmatpush3.bf16.msk.msra.mxu0 %vm4385_vm5, %v3861_v37 }
 0xd3a   :  { %v3452_v39 = vpop.f32.mrb[26].mxu0 }
 0xd3b   :  { %v1713_v40 = vadd.f32 %v3452_v39, %v2862_v38  ;;  %v1707_v41 = vpop.f32.mrb[27].mxu0 }
 0xd3c   :  { %v1708_v42 = vadd.f32 %v2862_v38, %v1707_v41  ;;  %3458 = vmatmul.mubr.msk.f32.vlgmr.msra.gmra.mrb[28].mxu0 %vm510_vm2, %v4399_v51 }
 0xd3d   :  { %3460 = vmatprep.mubr.msk.f32.mxu0 %vm510_vm2, %v4404_v53 }
 0xd3e   :  { %v3867_v46 = vpack.c.bf16 %v1713_v40, %v1708_v42 }
 0xd40   :  { %3461 = vmatmul.mubr.msk.f32.gmra.mrb[30].mxu0 %vm510_vm2, %v4413_v58  ;;  %3869 = vmatprep.subr.msk.bf16.mxu1 %vm4385_vm5, %v3867_v46 }
 0xd41   :  { %3872 = vmatpush3.bf16.msk.msra.mxu1 %vm4385_vm5, %v3867_v46  ;;  %3463 = vmatprep.mubr.msk.f32.mxu0 %vm510_vm2, %v4418_v60 }
 0xd42   :  { %3904 = vmatprep.subr.bf16.mxu1 %v4576_v44 }
 0xd44   :  { %3464 = vmatmul.mubr.msk.f32.gmra.mrb[32].mxu0 %vm510_vm2, %v4431_v61  ;;  %3477 = vmatmul.mubr.msk.f32.vlgmr.msra.gmra.mrb[20].mxu1 %vm510_vm2, %v4399_v51  ;;  %v1532_v51 = vadd.f32 %v2846_v6, %v1531_v29 }
 0xd45   :  { %3466 = vmatprep.mubr.msk.f32.mxu0 %vm510_vm2, %v4436_v63  ;;  %3479 = vmatprep.mubr.msk.f32.mxu1 %vm510_vm2, %v4404_v53 }
 0xd46   :  { %3906 = vmatpush3.bf16.msra.mxu1 %v4576_v44 }
 0xd47   :  { %3908 = vmatprep.subr.bf16.mxu1 %v4600_v59 }
 0xd48   :  { %3467 = vmatmul.mubr.msk.f32.gmra.mrb[34].mxu0 %vm510_vm2, %v4447_v0  ;;  %3480 = vmatmul.mubr.msk.f32.gmra.mrb[22].mxu1 %vm510_vm2, %v4413_v58 }
 0xd49   :  { %3469 = vmatprep.mubr.msk.f32.mxu0 %vm510_vm2, %v4454_v1  ;;  %3482 = vmatprep.mubr.msk.f32.mxu1 %vm510_vm2, %v4418_v60 }
 0xd4a   :  { %3910 = vmatpush3.bf16.msra.mxu1 %v4600_v59 }
 0xd4b   :  { %3912 = vmatprep.subr.bf16.mxu1 %v4610_v7 }
 0xd4c   :  { %3470 = vmatmul.mubr.msk.f32.gmra.mrb[36].mxu0 %vm510_vm2, %v4465_v2  ;;  %3483 = vmatmul.mubr.msk.f32.gmra.mrb[24].mxu1 %vm510_vm2, %v4431_v61 }
 0xd4d   :  { %3511 = vmatprep.mubr.msk.f32.mxu0 %vm798_vm6, %v1532_v51  ;;  %3485 = vmatprep.mubr.msk.f32.mxu1 %vm510_vm2, %v4436_v63 }
 0xd4e   :  { %3914 = vmatpush3.bf16.msra.mxu1 %v4610_v7 }
 0xd4f   :  { %3916 = vmatprep.subr.bf16.mxu1 %v4622_v14 }
 0xd50   :  { %3486 = vmatmul.mubr.msk.f32.gmra.mrb[26].mxu1 %vm510_vm2, %v4447_v0 }
 0xd51   :  { %3488 = vmatprep.mubr.msk.f32.mxu1 %vm510_vm2, %v4454_v1 }
 0xd52   :  { %3918 = vmatpush3.bf16.msra.mxu1 %v4622_v14 }
 0xd53   :  { %3920 = vmatprep.subr.bf16.mxu1 %v4629_v16 }
 0xd54   :  { %3489 = vmatmul.mubr.msk.f32.gmra.mrb[28].mxu1 %vm510_vm2, %v4465_v2 }
 0xd56   :  { %3922 = vmatpush3.bf16.msra.mxu1 %v4629_v16 }
 0xe0f   :  { %v3459_v53 = vpop.f32.mrb[28].mxu0 }
 0xe10   :  { %v1835_v58 = vmul.f32 %v3459_v53, %v4485_v4  ;;  %v1785_v60 = vpop.f32.mrb[29].mxu0 }
 0xe11   :  { %v1834_v61 = vmul.f32 %v1785_v60, %v4490_v5 }
 0xe13   :  { %v3873_v63 = vpack.c.bf16 %v1835_v58, %v1834_v61  ;;  %v3462_v0 = vpop.f32.mrb[30].mxu0 }
 0xe14   :  { %v1837_v44 = vmul.f32 %v3462_v0, %v4497_v10  ;;  %v1795_v1 = vpop.f32.mrb[31].mxu0 }
 0xe15   :  { %3875 = vmatprep.subr.msk.bf16.mxu0 %vm4501_vm7, %v3873_v63  ;;  %v1836_v59 = vmul.f32 %v1795_v1, %v4508_v12  ;;  %v2906_v1 = vld [vmem:[%s5093_s9 + $0x58] sm:$0xff] }
 0xe16   :  { %3878 = vmatpush3.bf16.xpose.msk.msra.mxu0 %vm4501_vm7, %v3873_v63 }
 0xe17   :  { %v3879_v2 = vpack.c.bf16 %v1837_v44, %v1836_v59  ;;  %v3465_v7 = vpop.f32.mrb[32].mxu0  ;;  %v3478_v6 = vpop.f32.mrb[20].mxu1 }
 0xe18   :  { %v1839_v14 = vmul.f32 %v3465_v7, %v4517_v18  ;;  %v1805_v16 = vpop.f32.mrb[33].mxu0  ;;  %v1963_v27 = vmul.f32 %v3478_v6, %v4485_v4  ;;  %v1913_v11 = vpop.f32.mrb[21].mxu1  ;;  %v2908_v7 = vld [vmem:[%s5093_s9 + $0x68] sm:$0xff] }
 0xe19   :  { %3881 = vmatprep.subr.msk.bf16.mxu0 %vm4501_vm7, %v3879_v2  ;;  %v1838_v49 = vmul.f32 %v1805_v16, %v4524_v19  ;;  %v1962_v29 = vmul.f32 %v1913_v11, %v4490_v5  ;;  %v2909_v16 = vld [vmem:[%s5093_s9 + $0x70] sm:$0xff] }
 0xe1b   :  { %v3885_v52 = vpack.c.bf16 %v1839_v14, %v1838_v49  ;;  %v3468_v54 = vpop.f32.mrb[34].mxu0  ;;  %v3481_v30 = vpop.f32.mrb[22].mxu1  ;;  %v2910_v49 = vld [vmem:[%s5093_s9 + $0x78] sm:$0xff] }
 0xe1c   :  { %v1841_v55 = vmul.f32 %v3468_v54, %v4533_v25  ;;  %v1815_v57 = vpop.f32.mrb[35].mxu0  ;;  %v1923_v31 = vpop.f32.mrb[23].mxu1 }
 0xe1d   :  { %v1840_v8 = vmul.f32 %v1815_v57, %v4538_v26  ;;  %v1964_v34 = vmul.f32 %v1923_v31, %v4508_v12 }
 0xe1e   :  { %3884 = vmatpush3.bf16.xpose.msk.msra.mxu0 %vm4501_vm7, %v3879_v2  ;;  %v2907_v2 = vld [vmem:[%s5093_s9 + $0x60] sm:$0xff] }
 0xe1f   :  { %3887 = vmatprep.subr.msk.bf16.mxu0 %vm4501_vm7, %v3885_v52  ;;  %v3891_v9 = vpack.c.bf16 %v1841_v55, %v1840_v8  ;;  %v3471_v13 = vpop.f32.mrb[36].mxu0  ;;  %v3951_v14 = vpack.c.bf16 %v2908_v7, %v2907_v2  ;;  %v2933_v7 = vld [vmem:[%s5097_s13 + $0xd0] sm:$0xff] }
 0xe20   :  { %v1843_v15 = vmul.f32 %v3471_v13, %v4545_v32  ;;  %v1825_v17 = vpop.f32.mrb[37].mxu0 }
 0xe21   :  { %v1842_v20 = vmul.f32 %v1825_v17, %v4552_v33 }
 0xe23   :  { %v3897_v62 = vpack.c.bf16 %v1843_v15, %v1842_v20 }
 0xe26   :  { %3890 = vmatpush3.bf16.xpose.msk.msra.mxu0 %vm4501_vm7, %v3885_v52  ;;  %v3955_v52 = vpack.c.bf16 %v2910_v49, %v2909_v16  ;;  %v2935_v49 = vld [vmem:[%s5097_s13 + $0xe0] sm:$0xff] }
 0xe27   :  { %3893 = vmatprep.subr.msk.bf16.mxu0 %vm4501_vm7, %v3891_v9 }
 0xe2e   :  { %3896 = vmatpush3.bf16.xpose.msk.msra.mxu0 %vm4501_vm7, %v3891_v9 }
 0xe2f   :  { %3899 = vmatprep.subr.msk.bf16.mxu0 %vm4501_vm7, %v3897_v62 }
 0xe36   :  { %3902 = vmatpush3.bf16.xpose.msk.msra.mxu0 %vm4501_vm7, %v3897_v62  ;;  %v2914_v62 = vld [vmem:[%s5094_s10 + $0x1] ss:$0 sm:$0xff] }
 0xe3d   :  { %3512 = vmatmul.mubr.msk.f32.vlgmr.msra.gmra.mrb[38].mxu0 %vm798_vm6, %v4822_v28  ;;  %v1965_v28 = vmul.f32 %v3481_v30, %v4497_v10 }
 0xe3f   :  { %v3927_v37 = vpack.c.bf16 %v1965_v28, %v1964_v34 }
 0xf10   :  { %v3513_v50 = vpop.f32.mrb[38].mxu0 }
 0xf11   :  { %v2080_v21 = vadd.f32 %v3513_v50, %v4583_v45  ;;  %v2074_v22 = vpop.f32.mrb[39].mxu0  ;;  %v3923_v45 = vpack.c.bf16 %v1963_v27, %v1962_v29 }
 0xf12   :  { %v2075_v23 = vadd.f32 %v2074_v22, %v4588_v43  ;;  %v3484_v43 = vpop.f32.mrb[24].mxu1 }
 0xf13   :  { %v2086_v24 = vsel %vm914_vm8, %v2080_v21, -inf  ;;  %v1967_v35 = vmul.f32 %v3484_v43, %v4517_v18  ;;  %v1933_v36 = vpop.f32.mrb[25].mxu1  ;;  %3924 = vmatprep.subr.bf16.mxu1 %v3923_v45  ;;  %v2915_v43 = vld [vmem:[%s5095_s11 + $0x20] sm:$0xff] }
 0xf14   :  { %2087 = vmax.xlane.f32.xlu1 %v2086_v24  ;;  %v2083_v3 = vsel %vm910_vm9, %v2075_v23, -inf  ;;  %v1966_v38 = vmul.f32 %v1933_v36, %v4524_v19  ;;  %v3487_v39 = vpop.f32.mrb[26].mxu1  ;;  %v2917_v36 = vld [vmem:[%s5095_s11 + $0x30] sm:$0xff] }
 0xf15   :  { %2084 = vmax.xlane.f32.xlu0 %v2083_v3  ;;  %v1969_v4 = vmul.f32 %v3487_v39, %v4533_v25  ;;  %v1943_v40 = vpop.f32.mrb[27].mxu1 }
 0xf16   :  { %v3931_v5 = vpack.c.bf16 %v1967_v35, %v1966_v38  ;;  %v1968_v41 = vmul.f32 %v1943_v40, %v4538_v26  ;;  %v3490_v10 = vpop.f32.mrb[28].mxu1  ;;  %v2903_v26 = vld [vmem:[%s5093_s9 + $0x40] sm:$0xff]  ;;  %v2916_v35 = vld [vmem:[%s5095_s11 + $0x28] sm:$0xff]  ;;  %v2918_v38 = vld [vmem:[%s5095_s11 + $0x38] sm:$0xff] }
 0xf17   :  { %v1971_v46 = vmul.f32 %v3490_v10, %v4545_v32  ;;  %v1953_v12 = vpop.f32.mrb[29].mxu1  ;;  %v2904_v32 = vld [vmem:[%s5093_s9 + $0x48] sm:$0xff]  ;;  %v3963_v39 = vpack.c.bf16 %v2918_v38, %v2917_v36  ;;  %v2597_v38 = vld [vmem:[%s5105_s21] sm:$0x3] }
 0xf18   :  { %v3935_v42 = vpack.c.bf16 %v1969_v4, %v1968_v41  ;;  %v1970_v51 = vmul.f32 %v1953_v12, %v4552_v33  ;;  %v2905_v33 = vld [vmem:[%s5093_s9 + $0x50] sm:$0xff]  ;;  %v3943_v44 = vpack.c.bf16 %v2904_v32, %v2903_v26  ;;  %v2923_v4 = vld [vmem:[%s5097_s13 + $0x80] sm:$0xff]  ;;  %v2924_v40 = vld [vmem:[%s5097_s13 + $0x88] sm:$0xff] }
 0xf19   :  { %v3947_v59 = vpack.c.bf16 %v2906_v1, %v2905_v33  ;;  %v2929_v32 = vld [vmem:[%s5097_s13 + $0xb0] sm:$0xff]  ;;  %v2930_v33 = vld [vmem:[%s5097_s13 + $0xb8] sm:$0xff]  ;;  %v2931_v1 = vld [vmem:[%s5097_s13 + $0xc0] sm:$0xff] }
 0xf1a   :  { %v3939_v18 = vpack.c.bf16 %v1971_v46, %v1970_v51  ;;  %3944 = vmatprep.subr.bf16.mxu0 %v3943_v44 }
 0xf1b   :  { %3946 = vmatpush3.bf16.msra.mxu0 %v3943_v44  ;;  %v3979_v44 = vpack.c.bf16 %v2930_v33, %v2929_v32 }
 0xf1c   :  { %3948 = vmatprep.subr.bf16.mxu0 %v3947_v59 }
 0xf1f   :  { %3950 = vmatpush3.bf16.msra.mxu0 %v3947_v59  ;;  %v2932_v59 = vld [vmem:[%s5097_s13 + $0xc8] sm:$0xff] }
 0xf20   :  { %3952 = vmatprep.subr.bf16.mxu0 %v3951_v14  ;;  %v3983_v2 = vpack.c.bf16 %v2932_v59, %v2931_v1 }
 0xf23   :  { %3954 = vmatpush3.bf16.msra.mxu0 %v3951_v14  ;;  %v2934_v14 = vld [vmem:[%s5097_s13 + $0xd8] sm:$0xff] }
 0xf24   :  { %3956 = vmatprep.subr.bf16.mxu0 %v3955_v52  ;;  %v3987_v16 = vpack.c.bf16 %v2934_v14, %v2933_v7 }
 0xf27   :  { %3958 = vmatpush3.bf16.msra.mxu0 %v3955_v52  ;;  %v2936_v52 = vld [vmem:[%s5097_s13 + $0xe8] sm:$0xff] }
 0xfa1   :  { %v2088_v53 = vpop.xlane.xlu1 %2087 }
 0xfa2   :  { %v2090_v58 = vsub.f32 %v2080_v21, %v2088_v53  ;;  %v2085_v60 = vpop.xlane.xlu0 %2084  ;;  %v2925_v53 = vld [vmem:[%s5097_s13 + $0x90] sm:$0xff] }
 0xfa3   :  { %v2089_v61 = vsub.f32 %v2075_v23, %v2085_v60 }
 0xfa4   :  { %v2093_v19 = vmul.f32 1.442695, %v2090_v58  ;;  %v2926_v58 = vld [vmem:[%s5097_s13 + $0x98] sm:$0xff] }
 0xfa5   :  { %v2091_v63 = vmul.f32 1.442695, %v2089_v61 }
 0xfa7   :  { %4038 = vpow2.f32 %v2091_v63  ;;  %v3971_v63 = vpack.c.bf16 %v2926_v58, %v2925_v53 }
 0xfa8   :  { %4040 = vpow2.f32 %v2093_v19 }
 0xfb1   :  { %v4039_v25 = vpop.eup %4038 }
 0xfb2   :  { %v4041_v0 = vpop.eup %4040  ;;  %3534 = vmatprep.mubr.msk.f32.mxu1 %vm910_vm9, %v4039_v25 }
 0xfb3   :  { %3535 = vmatmul.mubr.msk.f32.vlgmr.msra.gmra.mrb[30].mxu1 %vm910_vm9, %v4041_v0 }
 0xfb4   :  { %3926 = vmatpush3.bf16.msra.mxu1 %v3923_v45 }
 0xfb5   :  { %3928 = vmatprep.subr.bf16.mxu1 %v3927_v37 }
 0xfb8   :  { %3930 = vmatpush3.bf16.msra.mxu1 %v3927_v37  ;;  %v3959_v37 = vpack.c.bf16 %v2916_v35, %v2915_v43 }
 0xfb9   :  { %3932 = vmatprep.subr.bf16.mxu1 %v3931_v5 }
 0xfbc   :  { %3934 = vmatpush3.bf16.msra.mxu1 %v3931_v5  ;;  %v3967_v5 = vpack.c.bf16 %v2924_v40, %v2923_v4 }
 0xfbd   :  { %3936 = vmatprep.subr.bf16.mxu1 %v3935_v42 }
 0xfc0   :  { %3938 = vmatpush3.bf16.msra.mxu1 %v3935_v42 }
 0xfc1   :  { %3940 = vmatprep.subr.bf16.mxu1 %v3939_v18 }
 0xfc4   :  { %3942 = vmatpush3.bf16.msra.mxu1 %v3939_v18 }
 0xfc5   :  { %3960 = vmatprep.subr.bf16.mxu1 %v3959_v37 }
0x1086   :  { %v3536_v54 = vpop.f32.mrb[30].mxu1 }
0x1087   :  { %4042 = vrcp.f32 %v3536_v54  ;;  %v2167_v55 = vpop.f32.mrb[31].mxu1  ;;  %v3991_v54 = vpack.c.bf16 %v2936_v52, %v2935_v49 }
0x1088   :  { %4044 = vrcp.f32 %v2167_v55  ;;  %v2937_v55 = vld [vmem:[%s5097_s13 + $0xf0] sm:$0xff] }
0x1091   :  { %v4043_v57 = vpop.eup %4042 }
0x1092   :  { %v4045_v8 = vpop.eup %4044  ;;  %v2179_v13 = vmul.f32 %v4043_v57, %v4041_v0  ;;  %v2928_v0 = vld [vmem:[%s5097_s13 + $0xa8] sm:$0xff]  ;;  %v2938_v57 = vld [vmem:[%s5097_s13 + $0xf8] sm:$0xff] }
0x1093   :  { %v2177_v9 = vmul.f32 %v4045_v8, %v4039_v25  ;;  %v2927_v25 = vld [vmem:[%s5097_s13 + $0xa0] sm:$0xff]  ;;  %v3995_v8 = vpack.c.bf16 %v2938_v57, %v2937_v55 }
0x1094   :  { %v3975_v26 = vpack.c.bf16 %v2928_v0, %v2927_v25 }
0x1095   :  { %3557 = vmatprep.mubr.msk.f32.mxu1 %vm910_vm9, %v2177_v9  ;;  %v2920_v9 = vld [vmem:[%s5096_s12 + $0x1] ss:$0 sm:$0xff] }
0x1096   :  { %3558 = vmatmul.mubr.msk.f32.vlgmr.msra.gmra.mrb[32].mxu1 %vm910_vm9, %v2179_v13 }
0x1097   :  { %3962 = vmatpush3.bf16.msra.mxu1 %v3959_v37 }
0x1098   :  { %3964 = vmatprep.subr.bf16.mxu1 %v3963_v39 }
0x109b   :  { %3966 = vmatpush3.bf16.msra.mxu1 %v3963_v39 }
0x109c   :  { %3968 = vmatprep.subr.bf16.mxu1 %v3967_v5 }
0x1169   :  { %v3559_v15 = vpop.f32.mrb[32].mxu1 }
0x116a   :  { %v2252_v17 = vpop.f32.mrb[33].mxu1 }
0x116b   :  { %3576 = vmatprep.mubr.msk.f32.mxu0 %vm798_vm6, %v2252_v17 }
0x116c   :  { %3577 = vmatmul.mubr.msk.f32.vlgmr.msra.gmra.mrb[40].mxu0 %vm798_vm6, %v3559_v15 }
0x123f   :  { %v3578_v20 = vpop.f32.mrb[40].mxu0 }
0x1240   :  { %v2352_v50 = vadd.f32 %v3578_v20, %v4763_v47  ;;  %v2342_v21 = vpop.f32.mrb[41].mxu0 }
0x1241   :  { %v2351_v22 = vadd.f32 %v2342_v21, %v4765_v56 }
0x1242   :  { %v4966_v23 = vadd.f32 %v2914_v62, %v2352_v50 }
0x1243   :  { %v4968_v24 = vadd.f32 %v2914_v62, %v2351_v22 }
0x1244   :  { %v2366_v3 = vsel %vm221_vm1, %v4966_v23, 0.0 }
0x1245   :  { %2367 = vadd.xlane.f32.xlu1 %v2366_v3  ;;  %v2363_v6 = vsel %vm217_vm0, %v4968_v24, 0.0 }
0x1246   :  { %2364 = vadd.xlane.f32.xlu0 %v2363_v6 }
0x12d2   :  { %v2368_v27 = vpop.xlane.xlu1 %2367 }
0x12d3   :  { %v2370_v11 = vmul.f32 0.03125, %v2368_v27  ;;  %v2365_v29 = vpop.xlane.xlu0 %2364 }
0x12d4   :  { %v2369_v30 = vmul.f32 0.03125, %v2365_v29 }
0x12d5   :  { %v2372_v47 = vsub.f32 %v4966_v23, %v2370_v11 }
0x12d6   :  { %v2371_v56 = vsub.f32 %v4968_v24, %v2369_v30 }
0x12d7   :  { %v2374_v28 = vmul.f32 %v2372_v47, %v2372_v47 }
0x12d8   :  { %v2373_v31 = vmul.f32 %v2371_v56, %v2371_v56 }
0x12d9   :  { %v2378_v45 = vsel %vm221_vm1, %v2374_v28, 0.0 }
0x12da   :  { %2379 = vadd.xlane.f32.xlu1 %v2378_v45  ;;  %v2375_v34 = vsel %vm217_vm0, %v2373_v31, 0.0  ;;  %v2940_v31 = vld [vmem:[%s5098_s14 + $0x1] ss:$0 sm:$0xff] }
0x12db   :  { %2376 = vadd.xlane.f32.xlu0 %v2375_v34 }
0x1367   :  { %v2380_v41 = vpop.xlane.xlu1 %2379 }
0x1368   :  { %v2382_v10 = vmul.f32 0.03125, %v2380_v41  ;;  %v2377_v42 = vpop.xlane.xlu0 %2376 }
0x1369   :  { %v2381_v46 = vmul.f32 0.03125, %v2377_v42  ;;  %v2688_v42 = vld [vmem:[%s5099_s15 + $0x8] sm:$0xff] }
0x136a   :  { %v2384_v12 = vadd.f32 1e-05, %v2382_v10  ;;  %v2687_v10 = vld [vmem:[%s5099_s15] sm:$0xff] }
0x136b   :  { %v2383_v51 = vadd.f32 1e-05, %v2381_v46  ;;  %v4004_v46 = vpack.c.bf16 %v2688_v42, %v2687_v10 }
0x136c   :  { %4046 = vrsqrt.f32 %v2384_v12  ;;  %v2689_v12 = vld [vmem:[%s5099_s15 + $0x10] sm:$0xff] }
0x136d   :  { %4048 = vrsqrt.f32 %v2383_v51  ;;  %v2690_v51 = vld [vmem:[%s5099_s15 + $0x18] sm:$0xff]  ;;  %s4056_s15 = scalar_lea.vmem %s2780_s8, 32 }
0x136e   :  { %p4057_p0 = scmp.ne.s32.totalorder %s2780_s8, %s4056_s15  ;;  %p4062_p2 = scmp.lt.s32.totalorder %s4056_s15, %s4056_s15 }
0x1370   :  { %p4063_p3 = por %p4062_p2, %p4061_p1 }
0x1372   :  { %p4064_p4 = pnand %p4063_p3, %p4057_p0 }
0x1376   :  { %v4047_v18 = vpop.eup %4046 }
0x1377   :  { %v4049_v60 = vpop.eup %4048  ;;  %v2388_v19 = vmul.f32 %v4047_v18, %v2372_v47  ;;  %v4081_v47 = vmov 0.0|0.0   ;;  %v4007_v18 = vpack.c.bf16 %v2690_v51, %v2689_v12 }
0x1378   :  { %v2387_v61 = vmul.f32 %v4049_v60, %v2371_v56  ;;  %3999 = vmatprep.subr.bf16.mxu0 %v4081_v47  ;;  %v4083_v56 = vmov 0.0  }
0x1379   :  { %3629 = vmatprep.mubr.msk.f32.mxu0 %vm4082_vm10, %v4083_v56 }
0x137a   :  { %3587 = vmatprep.mubr.msk.f32.mxu1 %vm217_vm0, %v2387_v61 }
0x137b   :  { %3588 = vmatmul.mubr.msk.f32.vlgmr.msra.gmra.mrb[34].mxu1 %vm217_vm0, %v2388_v19 }
0x137c   :  { %3970 = vmatpush3.bf16.msra.mxu1 %v3967_v5 }
0x137d   :  { %3972 = vmatprep.subr.bf16.mxu1 %v3971_v63 }
0x1380   :  { %3974 = vmatpush3.bf16.msra.mxu1 %v3971_v63  ;;  %v2943_v63 = vld [vmem:[%s5100_s16] ss:$0 sm:$0xff] }
0x1381   :  { %3976 = vmatprep.subr.bf16.mxu1 %v3975_v26 }
0x1384   :  { %3978 = vmatpush3.bf16.msra.mxu1 %v3975_v26 }
0x1385   :  { %3980 = vmatprep.subr.bf16.mxu1 %v3979_v44 }
0x1388   :  { %3982 = vmatpush3.bf16.msra.mxu1 %v3979_v44 }
0x1389   :  { %3984 = vmatprep.subr.bf16.mxu1 %v3983_v2 }
0x138c   :  { %3986 = vmatpush3.bf16.msra.mxu1 %v3983_v2 }
0x138d   :  { %3988 = vmatprep.subr.bf16.mxu1 %v3987_v16 }
0x1390   :  { %3990 = vmatpush3.bf16.msra.mxu1 %v3987_v16 }
0x1391   :  { %3992 = vmatprep.subr.bf16.mxu1 %v3991_v54 }
0x1394   :  { %3994 = vmatpush3.bf16.msra.mxu1 %v3991_v54 }
0x1395   :  { %3996 = vmatprep.subr.bf16.mxu1 %v3995_v8 }
0x1398   :  { %3998 = vmatpush3.bf16.msra.mxu1 %v3995_v8 }
0x144e   :  { %v3589_v13 = vpop.f32.mrb[34].mxu1 }
0x144f   :  { %v2480_v15 = vadd.f32 %v3589_v13, %v2920_v9  ;;  %v2474_v17 = vpop.f32.mrb[35].mxu1 }
0x1450   :  { %v2475_v20 = vadd.f32 %v2920_v9, %v2474_v17 }
0x1451   :  { %v2486_v62 = vmul.f32 0.70710677, %v2480_v15  ;;  %v2484_v11 = vmul.f32 0.5, %v2480_v15 }
0x1452   :  { %v2485_v50 = vmul.f32 0.70710677, %v2475_v20  ;;  %v2483_v6 = vmul.f32 0.5, %v2475_v20 }
0x1453   :  { %4050 = verf.f32 %v2486_v62 }
0x1454   :  { %4052 = verf.f32 %v2485_v50 }
0x145d   :  { %v4051_v21 = vpop.eup %4050 }
0x145e   :  { %v4053_v22 = vpop.eup %4052  ;;  %v2490_v3 = vadd.f32 1.0, %v4051_v21 }
0x145f   :  { %v2489_v27 = vadd.f32 1.0, %v4053_v22 }
0x1460   :  { %v2492_v30 = vmul.f32 %v2490_v3, %v2484_v11 }
0x1461   :  { %v2491_v29 = vmul.f32 %v2489_v27, %v2483_v6 }
0x1463   :  { %3622 = vmatprep.mubr.f32.mxu1 %v2491_v29 }
0x1464   :  { %3623 = vmatmul.mubr.f32.vlgmr.msra.gmra.mrb[36].mxu1 %v2492_v30 }
0x1537   :  { %v3624_v28 = vpop.f32.mrb[36].mxu1 }
0x1538   :  { %v2586_v45 = vadd.f32 %v3624_v28, %v4966_v23  ;;  %v2576_v34 = vpop.f32.mrb[37].mxu1 }
0x1539   :  { %v2585_v43 = vadd.f32 %v2576_v34, %v4968_v24 }
0x153a   :  { %v2596_v35 = vadd.f32 %v2940_v31, %v2586_v45 }
0x153b   :  { %v2595_v36 = vadd.f32 %v2940_v31, %v2585_v43 }
0x153d   :  { %v4000_v37 = vpack.c.bf16 %v2596_v35, %v2595_v36 }
0x153f   :  { %4002 = vmatpush3.bf16.msk.msra.mxu0 %vm4385_vm5, %v4000_v37 }
0x1540   :  { %4003 = vmatprep.subr.bf16.mxu0 %v4081_v47 }
0x1542   :  { %3630 = vmatmul.mubr.msk.f32.vlgmr.msra.gmra.mrb[42].mxu0 %vm510_vm2, %v2597_v38 }
0x1543   :  { %3640 = vmatprep.mubr.msk.f32.mxu0 %vm4082_vm10, %v4083_v56  ;;  %4005 = vmatpush3.bf16.msra.mxu0 %v4004_v46 }
0x1544   :  { %4006 = vmatprep.subr.bf16.mxu0 %v4081_v47 }
0x1547   :  { %4008 = vmatpush3.bf16.msra.mxu0 %v4007_v18 }
0x1615   :  { %v2670_v39 = vpop.f32.mrb[42].mxu0 }
0x1616   :  { %v3631_v4 = vpop.f32.mrb[43].mxu0  ;;  %v2674_v23 = vsel %vm221_vm1, %v2670_v39, 0.0 }
0x1617   :  { %2675 = vadd.xlane.f32.xlu0 %v2674_v23 }
0x16a4   :  { %v2676_v24 = vpop.xlane.xlu0 %2675 }
0x16a5   :  { %v2677_v40 = vmul.f32 0.03125, %v2676_v24 }
0x16a7   :  { %v2678_v5 = vsub.f32 %v2670_v39, %v2677_v40 }
0x16a9   :  { %v2679_v41 = vmul.f32 %v2678_v5, %v2678_v5 }
0x16ab   :  { %v2680_v48 = vsel %vm221_vm1, %v2679_v41, 0.0 }
0x16ac   :  { %2681 = vadd.xlane.f32.xlu1 %v2680_v48 }
0x1739   :  { %v2682_v53 = vpop.xlane.xlu1 %2681 }
0x173a   :  { %v2683_v58 = vmul.f32 0.03125, %v2682_v53 }
0x173c   :  { %v2684_v60 = vadd.f32 1e-05, %v2683_v58 }
0x173e   :  { %4054 = vrsqrt.f32 %v2684_v60 }
0x1748   :  { %v4055_v61 = vpop.eup %4054 }
0x1749   :  { %v2686_v19 = vmul.f32 %v4055_v61, %v2678_v5 }
0x174b   :  { %3641 = vmatmul.mubr.msk.f32.vlgmr.msra.gmra.mrb[44].mxu0 %vm217_vm0, %v2686_v19 }
0x181e   :  { %v2767_v25 = vpop.f32.mrb[44].mxu0 }
0x181f   :  { %v2768_v0 = vadd.f32 %v2943_v63, %v2767_v25  ;;  %v3642_v26 = vpop.f32.mrb[45].mxu0 }
0x1821   :  { %2772 = vst.msk [vmem:[#allocation2] sm:$0x3] %vm2771_vm11, %v2768_v0 }
0x1822   :  { %4067 = shalt.err (!%p4064_p4)
}
0x1823   :  { %s4068_s30 = scalar_lea.hbm %s5106_s22, 32 }
0x1824   :  { %p4069_p5 = scmp.ne.s32.totalorder %s5106_s22, %s4068_s30  ;;  %p4072_p6 = scmp.lt.u32.totalorder %s4068_s30, %s5106_s22 }
0x1826   :  { %p4074_p7 = pnand %p4072_p6, %p4069_p5 }
0x1828   :  { %4077 = shalt.err (!%p4074_p7)
}
0x1829   :  { %2782 = dma.vmem_to_hbm [thread:$0]  %s2780_s8, 32, %s5106_s22, [#allocation3]  }
0x182a   :  { %4078 = dma.done.wait [#allocation3], 32  }
0x182b   :  { %4079 = vsyncadd [#allocation3], 4294967264 }
0x182c   :  { %2786 = vsyncpa [#allocation3], 1 }

</bundles_post_ra>
